<compile_context>
chip_gen: v5e
topology: v5e:2x2
jax: 0.10.0
libtpu: 0.0.40
codegen_flags: <defaults>
</compile_context>

<pallas_src>
import functools
import numpy as np

import jax
import jax.numpy as jnp
from jax.experimental import pallas as pl
from jax.experimental.pallas import tpu as pltpu

# ----------------------------- model config ---------------------------------
PATCH_SIZE = 8
IN_CH = 3
D_MODEL = 32
HEADS = 2
HEAD_DIM = D_MODEL // HEADS
D_FF = 64
DEPTH = 2
N_CLS = 5
LN_EPS = 1e-5  # nn.LayerNorm default


# --------------------------- in-kernel helpers -------------------------------
def _erf_f32(x):
    # Abramowitz & Stegun 7.1.26 rational approximation, |err| < 1.5e-7.
    # lax.erf has no Mosaic lowering; matches torch's exact-GELU at f32 tolerance.
    a1, a2, a3, a4, a5 = 0.254829592, -0.284496736, 1.421413741, -1.453152027, 1.061405429
    p = 0.3275911
    ax = jnp.abs(x)
    t = 1.0 / (1.0 + p * ax)
    poly = ((((a5 * t + a4) * t + a3) * t + a2) * t + a1) * t
    y = 1.0 - poly * jnp.exp(-ax * ax)
    return jnp.where(x < 0.0, -y, y)


def _gelu_exact(x):
    return 0.5 * x * (1.0 + _erf_f32(x * 0.7071067811865476))


def _layernorm(x, g, b):
    mu = jnp.mean(x, axis=-1, keepdims=True)
    xc = x - mu
    var = jnp.mean(xc * xc, axis=-1, keepdims=True)  # biased variance (matches torch)
    return xc * jax.lax.rsqrt(var + LN_EPS) * g + b


# ----------------------------- fused Pallas kernel ---------------------------
def _segmenter_kernel(
    patches_ref,                       # (1, Np, C*ps*ps)   per-batch block
    pe_w_ref, pe_b_ref,                # (C*ps*ps, D), (1, D)
    cls_ref, pos_ref,                  # (1, D), (N, D)
    ln1_g_ref, ln1_b_ref,              # (DEPTH, 1, D)
    qkv_w_ref, qkv_b_ref,              # (DEPTH, D, 3D), (DEPTH, 1, 3D)
    proj_w_ref, proj_b_ref,            # (DEPTH, D, D), (DEPTH, 1, D)
    ln2_g_ref, ln2_b_ref,              # (DEPTH, 1, D)
    fc1_w_ref, fc1_b_ref,              # (DEPTH, D, Dff), (DEPTH, 1, Dff)
    fc2_w_ref, fc2_b_ref,              # (DEPTH, Dff, D), (DEPTH, 1, D)
    norm_g_ref, norm_b_ref,            # (1, D)
    dec_wT_ref, dec_bT_ref,            # (n_cls, D), (n_cls, 1)
    lh_ref, lwT_ref,                   # (H, Gh), (Gw, W)   separable bilinear factors
    out_ref,                           # (1, n_cls, H, W)   per-batch block (NCHW)
    *, N, NP8, Np, Gh, Gw,
):
    D = D_MODEL
    scale = HEAD_DIM ** -0.5

    # ---- patch embedding (Conv2d k=ps, stride=ps == patchify + linear) ----
    tok = (jnp.dot(patches_ref[0], pe_w_ref[...], preferred_element_type=jnp.float32)
           + pe_b_ref[...])                                    # (Np, D)

    # ---- [cls ; patch tokens] + pos embed, padded to NP8 (sublane-aligned) rows ----
    cls_tok = cls_ref[...] + pos_ref[0:1, :]                   # (1, D)
    tok = tok + pos_ref[1:N, :]                                # (Np, D)
    parts = [cls_tok, tok]
    if NP8 > N:
        parts.append(jnp.zeros((NP8 - N, D), jnp.float32))
    x = jnp.concatenate(parts, axis=0)                         # (NP8, D)

    # key-column mask: pad tokens are never attended to (pad rows stay inert)
    kmask = jax.lax.broadcasted_iota(jnp.int32, (NP8, NP8), 1) < N

    # ---- transformer blocks (DEPTH=2, statically unrolled; params indexed per depth) ----
    for l in range(DEPTH):
        h = _layernorm(x, ln1_g_ref[l], ln1_b_ref[l])
        qkv = (jnp.dot(h, qkv_w_ref[l], preferred_element_type=jnp.float32)
               + qkv_b_ref[l])                                 # (NP8, 3D)

        head_out = []
        for hd in range(HEADS):
            c0 = hd * HEAD_DIM
            q = qkv[:, c0:c0 + HEAD_DIM]
            k = qkv[:, D + c0:D + c0 + HEAD_DIM]
            v = qkv[:, 2 * D + c0:2 * D + c0 + HEAD_DIM]
            s = jax.lax.dot_general(q, k, (((1,), (1,)), ((), ())),
                                    preferred_element_type=jnp.float32) * scale
            s = jnp.where(kmask, s, -1e30)
            s = s - jnp.max(s, axis=-1, keepdims=True)
            p = jnp.exp(s)
            p = p * pl.reciprocal(jnp.sum(p, axis=-1, keepdims=True), approx=True)
            head_out.append(jnp.dot(p, v, preferred_element_type=jnp.float32))
        attn = jnp.concatenate(head_out, axis=-1)              # (NP8, D), lane-concat
        x = x + (jnp.dot(attn, proj_w_ref[l], preferred_element_type=jnp.float32)
                 + proj_b_ref[l])

        h2 = _layernorm(x, ln2_g_ref[l], ln2_b_ref[l])
        m = (jnp.dot(h2, fc1_w_ref[l], preferred_element_type=jnp.float32)
             + fc1_b_ref[l])
        m = _gelu_exact(m)
        x = x + (jnp.dot(m, fc2_w_ref[l], preferred_element_type=jnp.float32)
                 + fc2_b_ref[l])

    # ---- final encoder LayerNorm (return_features=True) ----
    xf = _layernorm(x, norm_g_ref[...], norm_b_ref[...])       # (NP8, D)

    # ---- DecoderLinear (transposed -> class-major) + separable bilinear upsample ----
    xp = xf[1:N, :]                                            # drop cls + pad -> (Np, D)
    logitsT = (jax.lax.dot_general(dec_wT_ref[...], xp, (((1,), (1,)), ((), ())),
                                   preferred_element_type=jnp.float32)
               + dec_bT_ref[...])                              # (n_cls, Np)

    lh = lh_ref[...]                                           # (H, Gh)
    lwT = lwT_ref[...]                                         # (Gw, W)
    for c in range(N_CLS):
        # grid view of class c logits (row-major Gh x Gw), built from lane slices
        g = jnp.concatenate(
            [logitsT[c:c + 1, p * Gw:(p + 1) * Gw] for p in range(Gh)], axis=0)  # (Gh, Gw)
        hg = jnp.dot(lh, g, preferred_element_type=jnp.float32)                  # (H, Gw)
        out_ref[0, c, :, :] = jnp.dot(hg, lwT, preferred_element_type=jnp.float32)  # (H, W)


# ----------------------------- bilinear weights -------------------------------
def _build_bilinear_matrix(out_size, in_size):
    """Row-stochastic interpolation matrix replicating torch bilinear, align_corners=False."""
    L = np.zeros((out_size, in_size), dtype=np.float32)
    if in_size == 1:
        L[:, 0] = 1.0
        return L
    scale = in_size / out_size
    for i in range(out_size):
        src = (i + 0.5) * scale - 0.5
        src = max(src, 0.0)
        i0 = min(int(np.floor(src)), in_size - 1)
        i1 = min(i0 + 1, in_size - 1)
        frac = src - i0
        L[i, i0] += 1.0 - frac
        L[i, i1] += frac
    return L


# ------------------------------- forward pass ---------------------------------
def segmenter_forward(im, params):
    """im: (B, C, H_ori, W_ori) float32 NCHW -> (B, n_cls, H_ori, W_ori)."""
    B, C, H_ori, W_ori = im.shape
    ps = PATCH_SIZE

    # padding() to patch multiple (fill_value=0)
    pad_h = (-H_ori) % ps
    pad_w = (-W_ori) % ps
    im_p = jnp.pad(im, ((0, 0), (0, 0), (0, pad_h), (0, pad_w)))
    H, W = H_ori + pad_h, W_ori + pad_w
    Gh, Gw = H // ps, W // ps
    Np = Gh * Gw
    N = Np + 1
    NP8 = ((N + 7) // 8) * 8
    Cpp = C * ps * ps

    # Patchify (layout-only; matches Conv2d weight order (C, ps, ps) flattening)
    patches = (im_p.reshape(B, C, Gh, ps, Gw, ps)
               .transpose(0, 2, 4, 1, 3, 5)
               .reshape(B, Np, Cpp))

    # Separable bilinear factors (replaces the former dense kron matrix)
    Lh = jnp.asarray(_build_bilinear_matrix(H, Gh))            # (H, Gh)
    LwT = jnp.asarray(_build_bilinear_matrix(W, Gw).T)         # (Gw, W)

    dec_wT = params["dec_w"].T                                 # (n_cls, D)
    dec_bT = params["dec_b"].T                                 # (n_cls, 1)

    operands = (
        patches,
        params["pe_w"], params["pe_b"],
        params["cls_token"], params["pos_embed"],
        params["ln1_g"], params["ln1_b"],
        params["qkv_w"], params["qkv_b"],
        params["proj_w"], params["proj_b"],
        params["ln2_g"], params["ln2_b"],
        params["fc1_w"], params["fc1_b"],
        params["fc2_w"], params["fc2_b"],
        params["norm_g"], params["norm_b"],
        dec_wT, dec_bT,
        Lh, LwT,
    )

    def _full_block(arr):
        nd = arr.ndim
        return pl.BlockSpec(tuple(arr.shape), lambda b, _nd=nd: (0,) * _nd)

    in_specs = [pl.BlockSpec((1, Np, Cpp), lambda b: (b, 0, 0))]   # per-batch patch slab
    in_specs += [_full_block(o) for o in operands[1:]]             # weights resident
    out_spec = pl.BlockSpec((1, N_CLS, H, W), lambda b: (b, 0, 0, 0))

    # Advisory cost estimate for XLA scheduling around the single fused call.
    flops_per_b = (
        2 * Np * Cpp * D_MODEL
        + DEPTH * (
            2 * NP8 * D_MODEL * 3 * D_MODEL
            + HEADS * (4 * NP8 * NP8 * HEAD_DIM)
            + 2 * NP8 * D_MODEL * D_MODEL
            + 4 * NP8 * D_MODEL * D_FF
        )
        + 2 * N_CLS * D_MODEL * Np
        + N_CLS * (2 * H * Gh * Gw + 2 * H * Gw * W)
    )
    transc_per_b = DEPTH * (HEADS * NP8 * NP8 + NP8 * D_FF)
    bytes_accessed = 4 * (sum(int(np.prod(o.shape)) for o in operands)
                          + B * N_CLS * H * W)

    kern = functools.partial(_segmenter_kernel, N=N, NP8=NP8, Np=Np, Gh=Gh, Gw=Gw)
    out = pl.pallas_call(
        kern,
        out_shape=jax.ShapeDtypeStruct((B, N_CLS, H, W), jnp.float32),
        grid=(B,),
        in_specs=in_specs,
        out_specs=out_spec,
        compiler_params=pltpu.CompilerParams(
            dimension_semantics=("parallel",),       # shards batch across TCs on v7x
            vmem_limit_bytes=32 * 1024 * 1024,
        ),
        cost_estimate=pl.CostEstimate(
            flops=int(B * flops_per_b),
            transcendentals=int(B * transc_per_b),
            bytes_accessed=int(bytes_accessed),
        ),
    )(*operands)

    # unpadding() back to original size — output is already NCHW, no transpose needed
    return out[:, :, :H_ori, :W_ori]


# ------------------------------- parameters ----------------------------------
def init_params(key, n_tokens):
    def nrm(k, shape):
        return 0.02 * jax.random.normal(k, shape, dtype=jnp.float32)

    keys = jax.random.split(key, 4 + DEPTH)
    params = {
        "pe_w": nrm(keys[0], (IN_CH * PATCH_SIZE * PATCH_SIZE, D_MODEL)),
        "pe_b": jnp.zeros((1, D_MODEL), jnp.float32),
        "cls_token": nrm(keys[1], (1, D_MODEL)),
        "pos_embed": nrm(keys[2], (n_tokens, D_MODEL)),
        "norm_g": jnp.ones((1, D_MODEL), jnp.float32),
        "norm_b": jnp.zeros((1, D_MODEL), jnp.float32),
        "dec_w": nrm(keys[3], (D_MODEL, N_CLS)),
        "dec_b": jnp.zeros((1, N_CLS), jnp.float32),
    }
    qkv_w, proj_w, fc1_w, fc2_w = [], [], [], []
    for l in range(DEPTH):
        bk = jax.random.split(keys[4 + l], 4)
        qkv_w.append(nrm(bk[0], (D_MODEL, 3 * D_MODEL)))
        proj_w.append(nrm(bk[1], (D_MODEL, D_MODEL)))
        fc1_w.append(nrm(bk[2], (D_MODEL, D_FF)))
        fc2_w.append(nrm(bk[3], (D_FF, D_MODEL)))
    params.update({
        "ln1_g": jnp.ones((DEPTH, 1, D_MODEL), jnp.float32),
        "ln1_b": jnp.zeros((DEPTH, 1, D_MODEL), jnp.float32),
        "qkv_w": jnp.stack(qkv_w),
        "qkv_b": jnp.zeros((DEPTH, 1, 3 * D_MODEL), jnp.float32),
        "proj_w": jnp.stack(proj_w),
        "proj_b": jnp.zeros((DEPTH, 1, D_MODEL), jnp.float32),
        "ln2_g": jnp.ones((DEPTH, 1, D_MODEL), jnp.float32),
        "ln2_b": jnp.zeros((DEPTH, 1, D_MODEL), jnp.float32),
        "fc1_w": jnp.stack(fc1_w),
        "fc1_b": jnp.zeros((DEPTH, 1, D_FF), jnp.float32),
        "fc2_w": jnp.stack(fc2_w),
        "fc2_b": jnp.zeros((DEPTH, 1, D_MODEL), jnp.float32),
    })
    return params


# ---------------------------------- main --------------------------------------
if __name__ == "__main__":
    key = jax.random.PRNGKey(0)
    k_im, k_par = jax.random.split(key)

    # H_ori=W_ori=14 with patch_size=8 exercises padding (->16) and unpadding (->14).
    B, H_ori, W_ori = 2, 14, 14
    im = jax.random.normal(k_im, (B, IN_CH, H_ori, W_ori), dtype=jnp.float32)

    H_pad = H_ori + ((-H_ori) % PATCH_SIZE)
    W_pad = W_ori + ((-W_ori) % PATCH_SIZE)
    n_tokens = 1 + (H_pad // PATCH_SIZE) * (W_pad // PATCH_SIZE)
    params = init_params(k_par, n_tokens)

    fwd = jax.jit(segmenter_forward)
    out = fwd(im, params)
    jax.block_until_ready(out)

    assert out.shape == (B, N_CLS, H_ori, W_ori), out.shape
    assert out.dtype == jnp.float32
    assert bool(jnp.all(jnp.isfinite(out)))
    print("KERNEL_OK")
</pallas_src>

<mosaic_0001>
module attributes {stable_mosaic.version = 11 : i64} {
  func.func @_segmenter_kernel(%arg0: i32, %arg1: memref<1x4x192xf32, #tpu.memory_space<vmem>>, %arg2: memref<192x32xf32, #tpu.memory_space<vmem>>, %arg3: memref<1x32xf32, #tpu.memory_space<vmem>>, %arg4: memref<1x32xf32, #tpu.memory_space<vmem>>, %arg5: memref<5x32xf32, #tpu.memory_space<vmem>>, %arg6: memref<2x1x32xf32, #tpu.memory_space<vmem>>, %arg7: memref<2x1x32xf32, #tpu.memory_space<vmem>>, %arg8: memref<2x32x96xf32, #tpu.memory_space<vmem>>, %arg9: memref<2x1x96xf32, #tpu.memory_space<vmem>>, %arg10: memref<2x32x32xf32, #tpu.memory_space<vmem>>, %arg11: memref<2x1x32xf32, #tpu.memory_space<vmem>>, %arg12: memref<2x1x32xf32, #tpu.memory_space<vmem>>, %arg13: memref<2x1x32xf32, #tpu.memory_space<vmem>>, %arg14: memref<2x32x64xf32, #tpu.memory_space<vmem>>, %arg15: memref<2x1x64xf32, #tpu.memory_space<vmem>>, %arg16: memref<2x64x32xf32, #tpu.memory_space<vmem>>, %arg17: memref<2x1x32xf32, #tpu.memory_space<vmem>>, %arg18: memref<1x32xf32, #tpu.memory_space<vmem>>, %arg19: memref<1x32xf32, #tpu.memory_space<vmem>>, %arg20: memref<5x32xf32, #tpu.memory_space<vmem>>, %arg21: memref<5x1xf32, #tpu.memory_space<vmem>>, %arg22: memref<16x2xf32, #tpu.memory_space<vmem>>, %arg23: memref<2x16xf32, #tpu.memory_space<vmem>>, %arg24: memref<1x5x16x16xf32, #tpu.memory_space<vmem>>) attributes {dimension_semantics = [#tpu.dimension_semantics<parallel>], iteration_bounds = array<i64: 2>, scalar_prefetch = 0 : i64, scratch_operands = 0 : i64, tpu.core_type = #tpu.core_type<tc>, window_params = [{transform_indices = @transform_0, window_bounds = array<i64: 1, 4, 192>}, {pipeline_mode = #tpu.pipeline_mode<synchronous>, transform_indices = @transform_1, window_bounds = array<i64: 192, 32>}, {pipeline_mode = #tpu.pipeline_mode<synchronous>, transform_indices = @transform_2, window_bounds = array<i64: 1, 32>}, {pipeline_mode = #tpu.pipeline_mode<synchronous>, transform_indices = @transform_3, window_bounds = array<i64: 1, 32>}, {pipeline_mode = #tpu.pipeline_mode<synchronous>, transform_indices = @transform_4, window_bounds = array<i64: 5, 32>}, {pipeline_mode = #tpu.pipeline_mode<synchronous>, transform_indices = @transform_5, window_bounds = array<i64: 2, 1, 32>}, {pipeline_mode = #tpu.pipeline_mode<synchronous>, transform_indices = @transform_6, window_bounds = array<i64: 2, 1, 32>}, {pipeline_mode = #tpu.pipeline_mode<synchronous>, transform_indices = @transform_7, window_bounds = array<i64: 2, 32, 96>}, {pipeline_mode = #tpu.pipeline_mode<synchronous>, transform_indices = @transform_8, window_bounds = array<i64: 2, 1, 96>}, {pipeline_mode = #tpu.pipeline_mode<synchronous>, transform_indices = @transform_9, window_bounds = array<i64: 2, 32, 32>}, {pipeline_mode = #tpu.pipeline_mode<synchronous>, transform_indices = @transform_10, window_bounds = array<i64: 2, 1, 32>}, {pipeline_mode = #tpu.pipeline_mode<synchronous>, transform_indices = @transform_11, window_bounds = array<i64: 2, 1, 32>}, {pipeline_mode = #tpu.pipeline_mode<synchronous>, transform_indices = @transform_12, window_bounds = array<i64: 2, 1, 32>}, {pipeline_mode = #tpu.pipeline_mode<synchronous>, transform_indices = @transform_13, window_bounds = array<i64: 2, 32, 64>}, {pipeline_mode = #tpu.pipeline_mode<synchronous>, transform_indices = @transform_14, window_bounds = array<i64: 2, 1, 64>}, {pipeline_mode = #tpu.pipeline_mode<synchronous>, transform_indices = @transform_15, window_bounds = array<i64: 2, 64, 32>}, {pipeline_mode = #tpu.pipeline_mode<synchronous>, transform_indices = @transform_16, window_bounds = array<i64: 2, 1, 32>}, {pipeline_mode = #tpu.pipeline_mode<synchronous>, transform_indices = @transform_17, window_bounds = array<i64: 1, 32>}, {pipeline_mode = #tpu.pipeline_mode<synchronous>, transform_indices = @transform_18, window_bounds = array<i64: 1, 32>}, {pipeline_mode = #tpu.pipeline_mode<synchronous>, transform_indices = @transform_19, window_bounds = array<i64: 5, 32>}, {pipeline_mode = #tpu.pipeline_mode<synchronous>, transform_indices = @transform_20, window_bounds = array<i64: 5, 1>}, {pipeline_mode = #tpu.pipeline_mode<synchronous>, transform_indices = @transform_21, window_bounds = array<i64: 16, 2>}, {pipeline_mode = #tpu.pipeline_mode<synchronous>, transform_indices = @transform_22, window_bounds = array<i64: 2, 16>}, {transform_indices = @transform_23, window_bounds = array<i64: 1, 5, 16, 16>}]} {
    %c0 = arith.constant 0 : index
    %c0_0 = arith.constant 0 : index
    %c0_1 = arith.constant 0 : index
    %0 = vector.load %arg1[%c0, %c0_0, %c0_1] : memref<1x4x192xf32, #tpu.memory_space<vmem>>, vector<1x4x192xf32>
    %1 = vector.shape_cast %0 : vector<1x4x192xf32> to vector<4x192xf32>
    %c0_2 = arith.constant 0 : index
    %c0_3 = arith.constant 0 : index
    %2 = vector.load %arg2[%c0_2, %c0_3] : memref<192x32xf32, #tpu.memory_space<vmem>>, vector<192x32xf32>
    %cst = arith.constant dense<0.000000e+00> : vector<4x32xf32>
    %3 = tpu.matmul %1, %2, %cst {dimension_numbers = #tpu.dot_dimension_numbers<[1], [0], [0], [1], [0, 0, 1, 1], [], []>} : vector<4x192xf32>, vector<192x32xf32>, vector<4x32xf32> -> vector<4x32xf32>
    %c0_4 = arith.constant 0 : index
    %c0_5 = arith.constant 0 : index
    %4 = vector.load %arg3[%c0_4, %c0_5] : memref<1x32xf32, #tpu.memory_space<vmem>>, vector<1x32xf32>
    %5 = vector.broadcast %4 : vector<1x32xf32> to vector<4x32xf32>
    %6 = arith.addf %3, %5 : vector<4x32xf32>
    %c0_6 = arith.constant 0 : index
    %c0_7 = arith.constant 0 : index
    %7 = vector.load %arg4[%c0_6, %c0_7] : memref<1x32xf32, #tpu.memory_space<vmem>>, vector<1x32xf32>
    %c0_8 = arith.constant 0 : index
    %c0_9 = arith.constant 0 : index
    %8 = vector.load %arg5[%c0_8, %c0_9] : memref<5x32xf32, #tpu.memory_space<vmem>>, vector<1x32xf32>
    %9 = arith.addf %7, %8 : vector<1x32xf32>
    %c1 = arith.constant 1 : index
    %c0_10 = arith.constant 0 : index
    %10 = vector.load %arg5[%c1, %c0_10] : memref<5x32xf32, #tpu.memory_space<vmem>>, vector<4x32xf32>
    %11 = arith.addf %6, %10 : vector<4x32xf32>
    %cst_11 = arith.constant 0.000000e+00 : f32
    %12 = vector.broadcast %cst_11 : f32 to vector<3x32xf32>
    %13 = tpu.concatenate %9, %11, %12 in 0 : vector<1x32xf32>, vector<4x32xf32>, vector<3x32xf32> -> vector<8x32xf32>
    %14 = tpu.iota {dimensions = array<i32: 1>} : vector<8x8xi32>
    %c5_i32 = arith.constant 5 : i32
    %15 = vector.broadcast %c5_i32 : i32 to vector<8x8xi32>
    %16 = arith.cmpi slt, %14, %15 : vector<8x8xi32>
    %c0_12 = arith.constant 0 : index
    %c0_13 = arith.constant 0 : index
    %c0_14 = arith.constant 0 : index
    %17 = vector.load %arg6[%c0_12, %c0_13, %c0_14] : memref<2x1x32xf32, #tpu.memory_space<vmem>>, vector<1x1x32xf32>
    %18 = vector.shape_cast %17 : vector<1x1x32xf32> to vector<1x32xf32>
    %c0_15 = arith.constant 0 : index
    %c0_16 = arith.constant 0 : index
    %c0_17 = arith.constant 0 : index
    %19 = vector.load %arg7[%c0_15, %c0_16, %c0_17] : memref<2x1x32xf32, #tpu.memory_space<vmem>>, vector<1x1x32xf32>
    %20 = vector.shape_cast %19 : vector<1x1x32xf32> to vector<1x32xf32>
    %cst_18 = arith.constant dense<0.000000e+00> : vector<8xf32>
    %21 = vector.multi_reduction <add>, %13, %cst_18 [1] : vector<8x32xf32> to vector<8xf32>
    %22 = vector.shape_cast %21 : vector<8xf32> to vector<8x1xf32>
    %cst_19 = arith.constant 3.200000e+01 : f32
    %23 = vector.broadcast %cst_19 : f32 to vector<8x1xf32>
    %24 = arith.divf %22, %23 : vector<8x1xf32>
    %25 = vector.broadcast %24 : vector<8x1xf32> to vector<8x32xf32>
    %26 = arith.subf %13, %25 : vector<8x32xf32>
    %27 = arith.mulf %26, %26 : vector<8x32xf32>
    %cst_20 = arith.constant dense<0.000000e+00> : vector<8xf32>
    %28 = vector.multi_reduction <add>, %27, %cst_20 [1] : vector<8x32xf32> to vector<8xf32>
    %29 = vector.shape_cast %28 : vector<8xf32> to vector<8x1xf32>
    %cst_21 = arith.constant 3.200000e+01 : f32
    %30 = vector.broadcast %cst_21 : f32 to vector<8x1xf32>
    %31 = arith.divf %29, %30 : vector<8x1xf32>
    %cst_22 = arith.constant 9.99999974E-6 : f32
    %32 = vector.broadcast %cst_22 : f32 to vector<8x1xf32>
    %33 = arith.addf %31, %32 : vector<8x1xf32>
    %34 = math.rsqrt %33 : vector<8x1xf32>
    %35 = vector.broadcast %34 : vector<8x1xf32> to vector<8x32xf32>
    %36 = arith.mulf %26, %35 : vector<8x32xf32>
    %37 = vector.broadcast %18 : vector<1x32xf32> to vector<8x32xf32>
    %38 = arith.mulf %36, %37 : vector<8x32xf32>
    %39 = vector.broadcast %20 : vector<1x32xf32> to vector<8x32xf32>
    %40 = arith.addf %38, %39 : vector<8x32xf32>
    %c0_23 = arith.constant 0 : index
    %c0_24 = arith.constant 0 : index
    %c0_25 = arith.constant 0 : index
    %41 = vector.load %arg8[%c0_23, %c0_24, %c0_25] : memref<2x32x96xf32, #tpu.memory_space<vmem>>, vector<1x32x96xf32>
    %42 = vector.shape_cast %41 : vector<1x32x96xf32> to vector<32x96xf32>
    %cst_26 = arith.constant dense<0.000000e+00> : vector<8x96xf32>
    %43 = tpu.matmul %40, %42, %cst_26 {dimension_numbers = #tpu.dot_dimension_numbers<[1], [0], [0], [1], [0, 0, 1, 1], [], []>} : vector<8x32xf32>, vector<32x96xf32>, vector<8x96xf32> -> vector<8x96xf32>
    %c0_27 = arith.constant 0 : index
    %c0_28 = arith.constant 0 : index
    %c0_29 = arith.constant 0 : index
    %44 = vector.load %arg9[%c0_27, %c0_28, %c0_29] : memref<2x1x96xf32, #tpu.memory_space<vmem>>, vector<1x1x96xf32>
    %45 = vector.shape_cast %44 : vector<1x1x96xf32> to vector<1x96xf32>
    %46 = vector.broadcast %45 : vector<1x96xf32> to vector<8x96xf32>
    %47 = arith.addf %43, %46 : vector<8x96xf32>
    %48 = vector.extract_strided_slice %47 {offsets = [0, 0], sizes = [8, 16], strides = [1, 1]} : vector<8x96xf32> to vector<8x16xf32>
    %49 = vector.extract_strided_slice %47 {offsets = [0, 32], sizes = [8, 16], strides = [1, 1]} : vector<8x96xf32> to vector<8x16xf32>
    %50 = vector.extract_strided_slice %47 {offsets = [0, 64], sizes = [8, 16], strides = [1, 1]} : vector<8x96xf32> to vector<8x16xf32>
    %cst_30 = arith.constant dense<0.000000e+00> : vector<8x8xf32>
    %51 = tpu.matmul %48, %49, %cst_30 {dimension_numbers = #tpu.dot_dimension_numbers<[1], [1], [0], [0], [0, 0, 1, 0], [], []>} : vector<8x16xf32>, vector<8x16xf32>, vector<8x8xf32> -> vector<8x8xf32>
    %cst_31 = arith.constant 2.500000e-01 : f32
    %52 = vector.broadcast %cst_31 : f32 to vector<8x8xf32>
    %53 = arith.mulf %51, %52 : vector<8x8xf32>
    %cst_32 = arith.constant -1.000000e+30 : f32
    %54 = vector.broadcast %cst_32 : f32 to vector<8x8xf32>
    %55 = arith.select %16, %53, %54 : vector<8x8xi1>, vector<8x8xf32>
    %cst_33 = arith.constant dense<0xFF800000> : vector<8xf32>
    %56 = vector.multi_reduction <maximumf>, %55, %cst_33 [1] : vector<8x8xf32> to vector<8xf32>
    %57 = vector.shape_cast %56 : vector<8xf32> to vector<8x1xf32>
    %58 = vector.broadcast %57 : vector<8x1xf32> to vector<8x8xf32>
    %59 = arith.subf %55, %58 : vector<8x8xf32>
    %60 = math.exp %59 : vector<8x8xf32>
    %cst_34 = arith.constant dense<0.000000e+00> : vector<8xf32>
    %61 = vector.multi_reduction <add>, %60, %cst_34 [1] : vector<8x8xf32> to vector<8xf32>
    %62 = vector.shape_cast %61 : vector<8xf32> to vector<8x1xf32>
    %63 = tpu.reciprocal %62 {approx = true} : vector<8x1xf32> -> vector<8x1xf32>
    %64 = vector.broadcast %63 : vector<8x1xf32> to vector<8x8xf32>
    %65 = arith.mulf %60, %64 : vector<8x8xf32>
    %cst_35 = arith.constant dense<0.000000e+00> : vector<8x16xf32>
    %66 = tpu.matmul %65, %50, %cst_35 {dimension_numbers = #tpu.dot_dimension_numbers<[1], [0], [0], [1], [0, 0, 1, 1], [], []>} : vector<8x8xf32>, vector<8x16xf32>, vector<8x16xf32> -> vector<8x16xf32>
    %67 = vector.extract_strided_slice %47 {offsets = [0, 16], sizes = [8, 16], strides = [1, 1]} : vector<8x96xf32> to vector<8x16xf32>
    %68 = vector.extract_strided_slice %47 {offsets = [0, 48], sizes = [8, 16], strides = [1, 1]} : vector<8x96xf32> to vector<8x16xf32>
    %69 = vector.extract_strided_slice %47 {offsets = [0, 80], sizes = [8, 16], strides = [1, 1]} : vector<8x96xf32> to vector<8x16xf32>
    %cst_36 = arith.constant dense<0.000000e+00> : vector<8x8xf32>
    %70 = tpu.matmul %67, %68, %cst_36 {dimension_numbers = #tpu.dot_dimension_numbers<[1], [1], [0], [0], [0, 0, 1, 0], [], []>} : vector<8x16xf32>, vector<8x16xf32>, vector<8x8xf32> -> vector<8x8xf32>
    %cst_37 = arith.constant 2.500000e-01 : f32
    %71 = vector.broadcast %cst_37 : f32 to vector<8x8xf32>
    %72 = arith.mulf %70, %71 : vector<8x8xf32>
    %cst_38 = arith.constant -1.000000e+30 : f32
    %73 = vector.broadcast %cst_38 : f32 to vector<8x8xf32>
    %74 = arith.select %16, %72, %73 : vector<8x8xi1>, vector<8x8xf32>
    %cst_39 = arith.constant dense<0xFF800000> : vector<8xf32>
    %75 = vector.multi_reduction <maximumf>, %74, %cst_39 [1] : vector<8x8xf32> to vector<8xf32>
    %76 = vector.shape_cast %75 : vector<8xf32> to vector<8x1xf32>
    %77 = vector.broadcast %76 : vector<8x1xf32> to vector<8x8xf32>
    %78 = arith.subf %74, %77 : vector<8x8xf32>
    %79 = math.exp %78 : vector<8x8xf32>
    %cst_40 = arith.constant dense<0.000000e+00> : vector<8xf32>
    %80 = vector.multi_reduction <add>, %79, %cst_40 [1] : vector<8x8xf32> to vector<8xf32>
    %81 = vector.shape_cast %80 : vector<8xf32> to vector<8x1xf32>
    %82 = tpu.reciprocal %81 {approx = true} : vector<8x1xf32> -> vector<8x1xf32>
    %83 = vector.broadcast %82 : vector<8x1xf32> to vector<8x8xf32>
    %84 = arith.mulf %79, %83 : vector<8x8xf32>
    %cst_41 = arith.constant dense<0.000000e+00> : vector<8x16xf32>
    %85 = tpu.matmul %84, %69, %cst_41 {dimension_numbers = #tpu.dot_dimension_numbers<[1], [0], [0], [1], [0, 0, 1, 1], [], []>} : vector<8x8xf32>, vector<8x16xf32>, vector<8x16xf32> -> vector<8x16xf32>
    %86 = tpu.concatenate %66, %85 in 1 : vector<8x16xf32>, vector<8x16xf32> -> vector<8x32xf32>
    %c0_42 = arith.constant 0 : index
    %c0_43 = arith.constant 0 : index
    %c0_44 = arith.constant 0 : index
    %87 = vector.load %arg10[%c0_42, %c0_43, %c0_44] : memref<2x32x32xf32, #tpu.memory_space<vmem>>, vector<1x32x32xf32>
    %88 = vector.shape_cast %87 : vector<1x32x32xf32> to vector<32x32xf32>
    %cst_45 = arith.constant dense<0.000000e+00> : vector<8x32xf32>
    %89 = tpu.matmul %86, %88, %cst_45 {dimension_numbers = #tpu.dot_dimension_numbers<[1], [0], [0], [1], [0, 0, 1, 1], [], []>} : vector<8x32xf32>, vector<32x32xf32>, vector<8x32xf32> -> vector<8x32xf32>
    %c0_46 = arith.constant 0 : index
    %c0_47 = arith.constant 0 : index
    %c0_48 = arith.constant 0 : index
    %90 = vector.load %arg11[%c0_46, %c0_47, %c0_48] : memref<2x1x32xf32, #tpu.memory_space<vmem>>, vector<1x1x32xf32>
    %91 = vector.shape_cast %90 : vector<1x1x32xf32> to vector<1x32xf32>
    %92 = vector.broadcast %91 : vector<1x32xf32> to vector<8x32xf32>
    %93 = arith.addf %89, %92 : vector<8x32xf32>
    %94 = arith.addf %13, %93 : vector<8x32xf32>
    %c0_49 = arith.constant 0 : index
    %c0_50 = arith.constant 0 : index
    %c0_51 = arith.constant 0 : index
    %95 = vector.load %arg12[%c0_49, %c0_50, %c0_51] : memref<2x1x32xf32, #tpu.memory_space<vmem>>, vector<1x1x32xf32>
    %96 = vector.shape_cast %95 : vector<1x1x32xf32> to vector<1x32xf32>
    %c0_52 = arith.constant 0 : index
    %c0_53 = arith.constant 0 : index
    %c0_54 = arith.constant 0 : index
    %97 = vector.load %arg13[%c0_52, %c0_53, %c0_54] : memref<2x1x32xf32, #tpu.memory_space<vmem>>, vector<1x1x32xf32>
    %98 = vector.shape_cast %97 : vector<1x1x32xf32> to vector<1x32xf32>
    %cst_55 = arith.constant dense<0.000000e+00> : vector<8xf32>
    %99 = vector.multi_reduction <add>, %94, %cst_55 [1] : vector<8x32xf32> to vector<8xf32>
    %100 = vector.shape_cast %99 : vector<8xf32> to vector<8x1xf32>
    %cst_56 = arith.constant 3.200000e+01 : f32
    %101 = vector.broadcast %cst_56 : f32 to vector<8x1xf32>
    %102 = arith.divf %100, %101 : vector<8x1xf32>
    %103 = vector.broadcast %102 : vector<8x1xf32> to vector<8x32xf32>
    %104 = arith.subf %94, %103 : vector<8x32xf32>
    %105 = arith.mulf %104, %104 : vector<8x32xf32>
    %cst_57 = arith.constant dense<0.000000e+00> : vector<8xf32>
    %106 = vector.multi_reduction <add>, %105, %cst_57 [1] : vector<8x32xf32> to vector<8xf32>
    %107 = vector.shape_cast %106 : vector<8xf32> to vector<8x1xf32>
    %cst_58 = arith.constant 3.200000e+01 : f32
    %108 = vector.broadcast %cst_58 : f32 to vector<8x1xf32>
    %109 = arith.divf %107, %108 : vector<8x1xf32>
    %cst_59 = arith.constant 9.99999974E-6 : f32
    %110 = vector.broadcast %cst_59 : f32 to vector<8x1xf32>
    %111 = arith.addf %109, %110 : vector<8x1xf32>
    %112 = math.rsqrt %111 : vector<8x1xf32>
    %113 = vector.broadcast %112 : vector<8x1xf32> to vector<8x32xf32>
    %114 = arith.mulf %104, %113 : vector<8x32xf32>
    %115 = vector.broadcast %96 : vector<1x32xf32> to vector<8x32xf32>
    %116 = arith.mulf %114, %115 : vector<8x32xf32>
    %117 = vector.broadcast %98 : vector<1x32xf32> to vector<8x32xf32>
    %118 = arith.addf %116, %117 : vector<8x32xf32>
    %c0_60 = arith.constant 0 : index
    %c0_61 = arith.constant 0 : index
    %c0_62 = arith.constant 0 : index
    %119 = vector.load %arg14[%c0_60, %c0_61, %c0_62] : memref<2x32x64xf32, #tpu.memory_space<vmem>>, vector<1x32x64xf32>
    %120 = vector.shape_cast %119 : vector<1x32x64xf32> to vector<32x64xf32>
    %cst_63 = arith.constant dense<0.000000e+00> : vector<8x64xf32>
    %121 = tpu.matmul %118, %120, %cst_63 {dimension_numbers = #tpu.dot_dimension_numbers<[1], [0], [0], [1], [0, 0, 1, 1], [], []>} : vector<8x32xf32>, vector<32x64xf32>, vector<8x64xf32> -> vector<8x64xf32>
    %c0_64 = arith.constant 0 : index
    %c0_65 = arith.constant 0 : index
    %c0_66 = arith.constant 0 : index
    %122 = vector.load %arg15[%c0_64, %c0_65, %c0_66] : memref<2x1x64xf32, #tpu.memory_space<vmem>>, vector<1x1x64xf32>
    %123 = vector.shape_cast %122 : vector<1x1x64xf32> to vector<1x64xf32>
    %124 = vector.broadcast %123 : vector<1x64xf32> to vector<8x64xf32>
    %125 = arith.addf %121, %124 : vector<8x64xf32>
    %cst_67 = arith.constant 5.000000e-01 : f32
    %126 = vector.broadcast %cst_67 : f32 to vector<8x64xf32>
    %127 = arith.mulf %126, %125 : vector<8x64xf32>
    %cst_68 = arith.constant 0.707106769 : f32
    %128 = vector.broadcast %cst_68 : f32 to vector<8x64xf32>
    %129 = arith.mulf %125, %128 : vector<8x64xf32>
    %130 = math.absf %129 : vector<8x64xf32>
    %cst_69 = arith.constant 0.327591091 : f32
    %131 = vector.broadcast %cst_69 : f32 to vector<8x64xf32>
    %132 = arith.mulf %131, %130 : vector<8x64xf32>
    %cst_70 = arith.constant 1.000000e+00 : f32
    %133 = vector.broadcast %cst_70 : f32 to vector<8x64xf32>
    %134 = arith.addf %133, %132 : vector<8x64xf32>
    %cst_71 = arith.constant 1.000000e+00 : f32
    %135 = vector.broadcast %cst_71 : f32 to vector<8x64xf32>
    %136 = arith.divf %135, %134 : vector<8x64xf32>
    %cst_72 = arith.constant 1.06140542 : f32
    %137 = vector.broadcast %cst_72 : f32 to vector<8x64xf32>
    %138 = arith.mulf %137, %136 : vector<8x64xf32>
    %cst_73 = arith.constant -1.45315206 : f32
    %139 = vector.broadcast %cst_73 : f32 to vector<8x64xf32>
    %140 = arith.addf %138, %139 : vector<8x64xf32>
    %141 = arith.mulf %140, %136 : vector<8x64xf32>
    %cst_74 = arith.constant 1.42141378 : f32
    %142 = vector.broadcast %cst_74 : f32 to vector<8x64xf32>
    %143 = arith.addf %141, %142 : vector<8x64xf32>
    %144 = arith.mulf %143, %136 : vector<8x64xf32>
    %cst_75 = arith.constant -0.284496725 : f32
    %145 = vector.broadcast %cst_75 : f32 to vector<8x64xf32>
    %146 = arith.addf %144, %145 : vector<8x64xf32>
    %147 = arith.mulf %146, %136 : vector<8x64xf32>
    %cst_76 = arith.constant 0.254829586 : f32
    %148 = vector.broadcast %cst_76 : f32 to vector<8x64xf32>
    %149 = arith.addf %147, %148 : vector<8x64xf32>
    %150 = arith.mulf %149, %136 : vector<8x64xf32>
    %cst_77 = arith.constant 0.000000e+00 : f32
    %151 = vector.broadcast %cst_77 : f32 to vector<8x64xf32>
    %152 = arith.subf %151, %130 : vector<8x64xf32>
    %153 = arith.mulf %152, %130 : vector<8x64xf32>
    %154 = math.exp %153 : vector<8x64xf32>
    %155 = arith.mulf %150, %154 : vector<8x64xf32>
    %cst_78 = arith.constant 1.000000e+00 : f32
    %156 = vector.broadcast %cst_78 : f32 to vector<8x64xf32>
    %157 = arith.subf %156, %155 : vector<8x64xf32>
    %cst_79 = arith.constant 0.000000e+00 : f32
    %158 = vector.broadcast %cst_79 : f32 to vector<8x64xf32>
    %159 = arith.cmpf olt, %129, %158 : vector<8x64xf32>
    %cst_80 = arith.constant 0.000000e+00 : f32
    %160 = vector.broadcast %cst_80 : f32 to vector<8x64xf32>
    %161 = arith.subf %160, %157 : vector<8x64xf32>
    %162 = arith.select %159, %161, %157 : vector<8x64xi1>, vector<8x64xf32>
    %cst_81 = arith.constant 1.000000e+00 : f32
    %163 = vector.broadcast %cst_81 : f32 to vector<8x64xf32>
    %164 = arith.addf %163, %162 : vector<8x64xf32>
    %165 = arith.mulf %127, %164 : vector<8x64xf32>
    %c0_82 = arith.constant 0 : index
    %c0_83 = arith.constant 0 : index
    %c0_84 = arith.constant 0 : index
    %166 = vector.load %arg16[%c0_82, %c0_83, %c0_84] : memref<2x64x32xf32, #tpu.memory_space<vmem>>, vector<1x64x32xf32>
    %167 = vector.shape_cast %166 : vector<1x64x32xf32> to vector<64x32xf32>
    %cst_85 = arith.constant dense<0.000000e+00> : vector<8x32xf32>
    %168 = tpu.matmul %165, %167, %cst_85 {dimension_numbers = #tpu.dot_dimension_numbers<[1], [0], [0], [1], [0, 0, 1, 1], [], []>} : vector<8x64xf32>, vector<64x32xf32>, vector<8x32xf32> -> vector<8x32xf32>
    %c0_86 = arith.constant 0 : index
    %c0_87 = arith.constant 0 : index
    %c0_88 = arith.constant 0 : index
    %169 = vector.load %arg17[%c0_86, %c0_87, %c0_88] : memref<2x1x32xf32, #tpu.memory_space<vmem>>, vector<1x1x32xf32>
    %170 = vector.shape_cast %169 : vector<1x1x32xf32> to vector<1x32xf32>
    %171 = vector.broadcast %170 : vector<1x32xf32> to vector<8x32xf32>
    %172 = arith.addf %168, %171 : vector<8x32xf32>
    %173 = arith.addf %94, %172 : vector<8x32xf32>
    %c1_89 = arith.constant 1 : index
    %c0_90 = arith.constant 0 : index
    %c0_91 = arith.constant 0 : index
    %174 = vector.load %arg6[%c1_89, %c0_90, %c0_91] : memref<2x1x32xf32, #tpu.memory_space<vmem>>, vector<1x1x32xf32>
    %175 = vector.shape_cast %174 : vector<1x1x32xf32> to vector<1x32xf32>
    %c1_92 = arith.constant 1 : index
    %c0_93 = arith.constant 0 : index
    %c0_94 = arith.constant 0 : index
    %176 = vector.load %arg7[%c1_92, %c0_93, %c0_94] : memref<2x1x32xf32, #tpu.memory_space<vmem>>, vector<1x1x32xf32>
    %177 = vector.shape_cast %176 : vector<1x1x32xf32> to vector<1x32xf32>
    %cst_95 = arith.constant dense<0.000000e+00> : vector<8xf32>
    %178 = vector.multi_reduction <add>, %173, %cst_95 [1] : vector<8x32xf32> to vector<8xf32>
    %179 = vector.shape_cast %178 : vector<8xf32> to vector<8x1xf32>
    %cst_96 = arith.constant 3.200000e+01 : f32
    %180 = vector.broadcast %cst_96 : f32 to vector<8x1xf32>
    %181 = arith.divf %179, %180 : vector<8x1xf32>
    %182 = vector.broadcast %181 : vector<8x1xf32> to vector<8x32xf32>
    %183 = arith.subf %173, %182 : vector<8x32xf32>
    %184 = arith.mulf %183, %183 : vector<8x32xf32>
    %cst_97 = arith.constant dense<0.000000e+00> : vector<8xf32>
    %185 = vector.multi_reduction <add>, %184, %cst_97 [1] : vector<8x32xf32> to vector<8xf32>
    %186 = vector.shape_cast %185 : vector<8xf32> to vector<8x1xf32>
    %cst_98 = arith.constant 3.200000e+01 : f32
    %187 = vector.broadcast %cst_98 : f32 to vector<8x1xf32>
    %188 = arith.divf %186, %187 : vector<8x1xf32>
    %cst_99 = arith.constant 9.99999974E-6 : f32
    %189 = vector.broadcast %cst_99 : f32 to vector<8x1xf32>
    %190 = arith.addf %188, %189 : vector<8x1xf32>
    %191 = math.rsqrt %190 : vector<8x1xf32>
    %192 = vector.broadcast %191 : vector<8x1xf32> to vector<8x32xf32>
    %193 = arith.mulf %183, %192 : vector<8x32xf32>
    %194 = vector.broadcast %175 : vector<1x32xf32> to vector<8x32xf32>
    %195 = arith.mulf %193, %194 : vector<8x32xf32>
    %196 = vector.broadcast %177 : vector<1x32xf32> to vector<8x32xf32>
    %197 = arith.addf %195, %196 : vector<8x32xf32>
    %c1_100 = arith.constant 1 : index
    %c0_101 = arith.constant 0 : index
    %c0_102 = arith.constant 0 : index
    %198 = vector.load %arg8[%c1_100, %c0_101, %c0_102] : memref<2x32x96xf32, #tpu.memory_space<vmem>>, vector<1x32x96xf32>
    %199 = vector.shape_cast %198 : vector<1x32x96xf32> to vector<32x96xf32>
    %cst_103 = arith.constant dense<0.000000e+00> : vector<8x96xf32>
    %200 = tpu.matmul %197, %199, %cst_103 {dimension_numbers = #tpu.dot_dimension_numbers<[1], [0], [0], [1], [0, 0, 1, 1], [], []>} : vector<8x32xf32>, vector<32x96xf32>, vector<8x96xf32> -> vector<8x96xf32>
    %c1_104 = arith.constant 1 : index
    %c0_105 = arith.constant 0 : index
    %c0_106 = arith.constant 0 : index
    %201 = vector.load %arg9[%c1_104, %c0_105, %c0_106] : memref<2x1x96xf32, #tpu.memory_space<vmem>>, vector<1x1x96xf32>
    %202 = vector.shape_cast %201 : vector<1x1x96xf32> to vector<1x96xf32>
    %203 = vector.broadcast %202 : vector<1x96xf32> to vector<8x96xf32>
    %204 = arith.addf %200, %203 : vector<8x96xf32>
    %205 = vector.extract_strided_slice %204 {offsets = [0, 0], sizes = [8, 16], strides = [1, 1]} : vector<8x96xf32> to vector<8x16xf32>
    %206 = vector.extract_strided_slice %204 {offsets = [0, 32], sizes = [8, 16], strides = [1, 1]} : vector<8x96xf32> to vector<8x16xf32>
    %207 = vector.extract_strided_slice %204 {offsets = [0, 64], sizes = [8, 16], strides = [1, 1]} : vector<8x96xf32> to vector<8x16xf32>
    %cst_107 = arith.constant dense<0.000000e+00> : vector<8x8xf32>
    %208 = tpu.matmul %205, %206, %cst_107 {dimension_numbers = #tpu.dot_dimension_numbers<[1], [1], [0], [0], [0, 0, 1, 0], [], []>} : vector<8x16xf32>, vector<8x16xf32>, vector<8x8xf32> -> vector<8x8xf32>
    %cst_108 = arith.constant 2.500000e-01 : f32
    %209 = vector.broadcast %cst_108 : f32 to vector<8x8xf32>
    %210 = arith.mulf %208, %209 : vector<8x8xf32>
    %cst_109 = arith.constant -1.000000e+30 : f32
    %211 = vector.broadcast %cst_109 : f32 to vector<8x8xf32>
    %212 = arith.select %16, %210, %211 : vector<8x8xi1>, vector<8x8xf32>
    %cst_110 = arith.constant dense<0xFF800000> : vector<8xf32>
    %213 = vector.multi_reduction <maximumf>, %212, %cst_110 [1] : vector<8x8xf32> to vector<8xf32>
    %214 = vector.shape_cast %213 : vector<8xf32> to vector<8x1xf32>
    %215 = vector.broadcast %214 : vector<8x1xf32> to vector<8x8xf32>
    %216 = arith.subf %212, %215 : vector<8x8xf32>
    %217 = math.exp %216 : vector<8x8xf32>
    %cst_111 = arith.constant dense<0.000000e+00> : vector<8xf32>
    %218 = vector.multi_reduction <add>, %217, %cst_111 [1] : vector<8x8xf32> to vector<8xf32>
    %219 = vector.shape_cast %218 : vector<8xf32> to vector<8x1xf32>
    %220 = tpu.reciprocal %219 {approx = true} : vector<8x1xf32> -> vector<8x1xf32>
    %221 = vector.broadcast %220 : vector<8x1xf32> to vector<8x8xf32>
    %222 = arith.mulf %217, %221 : vector<8x8xf32>
    %cst_112 = arith.constant dense<0.000000e+00> : vector<8x16xf32>
    %223 = tpu.matmul %222, %207, %cst_112 {dimension_numbers = #tpu.dot_dimension_numbers<[1], [0], [0], [1], [0, 0, 1, 1], [], []>} : vector<8x8xf32>, vector<8x16xf32>, vector<8x16xf32> -> vector<8x16xf32>
    %224 = vector.extract_strided_slice %204 {offsets = [0, 16], sizes = [8, 16], strides = [1, 1]} : vector<8x96xf32> to vector<8x16xf32>
    %225 = vector.extract_strided_slice %204 {offsets = [0, 48], sizes = [8, 16], strides = [1, 1]} : vector<8x96xf32> to vector<8x16xf32>
    %226 = vector.extract_strided_slice %204 {offsets = [0, 80], sizes = [8, 16], strides = [1, 1]} : vector<8x96xf32> to vector<8x16xf32>
    %cst_113 = arith.constant dense<0.000000e+00> : vector<8x8xf32>
    %227 = tpu.matmul %224, %225, %cst_113 {dimension_numbers = #tpu.dot_dimension_numbers<[1], [1], [0], [0], [0, 0, 1, 0], [], []>} : vector<8x16xf32>, vector<8x16xf32>, vector<8x8xf32> -> vector<8x8xf32>
    %cst_114 = arith.constant 2.500000e-01 : f32
    %228 = vector.broadcast %cst_114 : f32 to vector<8x8xf32>
    %229 = arith.mulf %227, %228 : vector<8x8xf32>
    %cst_115 = arith.constant -1.000000e+30 : f32
    %230 = vector.broadcast %cst_115 : f32 to vector<8x8xf32>
    %231 = arith.select %16, %229, %230 : vector<8x8xi1>, vector<8x8xf32>
    %cst_116 = arith.constant dense<0xFF800000> : vector<8xf32>
    %232 = vector.multi_reduction <maximumf>, %231, %cst_116 [1] : vector<8x8xf32> to vector<8xf32>
    %233 = vector.shape_cast %232 : vector<8xf32> to vector<8x1xf32>
    %234 = vector.broadcast %233 : vector<8x1xf32> to vector<8x8xf32>
    %235 = arith.subf %231, %234 : vector<8x8xf32>
    %236 = math.exp %235 : vector<8x8xf32>
    %cst_117 = arith.constant dense<0.000000e+00> : vector<8xf32>
    %237 = vector.multi_reduction <add>, %236, %cst_117 [1] : vector<8x8xf32> to vector<8xf32>
    %238 = vector.shape_cast %237 : vector<8xf32> to vector<8x1xf32>
    %239 = tpu.reciprocal %238 {approx = true} : vector<8x1xf32> -> vector<8x1xf32>
    %240 = vector.broadcast %239 : vector<8x1xf32> to vector<8x8xf32>
    %241 = arith.mulf %236, %240 : vector<8x8xf32>
    %cst_118 = arith.constant dense<0.000000e+00> : vector<8x16xf32>
    %242 = tpu.matmul %241, %226, %cst_118 {dimension_numbers = #tpu.dot_dimension_numbers<[1], [0], [0], [1], [0, 0, 1, 1], [], []>} : vector<8x8xf32>, vector<8x16xf32>, vector<8x16xf32> -> vector<8x16xf32>
    %243 = tpu.concatenate %223, %242 in 1 : vector<8x16xf32>, vector<8x16xf32> -> vector<8x32xf32>
    %c1_119 = arith.constant 1 : index
    %c0_120 = arith.constant 0 : index
    %c0_121 = arith.constant 0 : index
    %244 = vector.load %arg10[%c1_119, %c0_120, %c0_121] : memref<2x32x32xf32, #tpu.memory_space<vmem>>, vector<1x32x32xf32>
    %245 = vector.shape_cast %244 : vector<1x32x32xf32> to vector<32x32xf32>
    %cst_122 = arith.constant dense<0.000000e+00> : vector<8x32xf32>
    %246 = tpu.matmul %243, %245, %cst_122 {dimension_numbers = #tpu.dot_dimension_numbers<[1], [0], [0], [1], [0, 0, 1, 1], [], []>} : vector<8x32xf32>, vector<32x32xf32>, vector<8x32xf32> -> vector<8x32xf32>
    %c1_123 = arith.constant 1 : index
    %c0_124 = arith.constant 0 : index
    %c0_125 = arith.constant 0 : index
    %247 = vector.load %arg11[%c1_123, %c0_124, %c0_125] : memref<2x1x32xf32, #tpu.memory_space<vmem>>, vector<1x1x32xf32>
    %248 = vector.shape_cast %247 : vector<1x1x32xf32> to vector<1x32xf32>
    %249 = vector.broadcast %248 : vector<1x32xf32> to vector<8x32xf32>
    %250 = arith.addf %246, %249 : vector<8x32xf32>
    %251 = arith.addf %173, %250 : vector<8x32xf32>
    %c1_126 = arith.constant 1 : index
    %c0_127 = arith.constant 0 : index
    %c0_128 = arith.constant 0 : index
    %252 = vector.load %arg12[%c1_126, %c0_127, %c0_128] : memref<2x1x32xf32, #tpu.memory_space<vmem>>, vector<1x1x32xf32>
    %253 = vector.shape_cast %252 : vector<1x1x32xf32> to vector<1x32xf32>
    %c1_129 = arith.constant 1 : index
    %c0_130 = arith.constant 0 : index
    %c0_131 = arith.constant 0 : index
    %254 = vector.load %arg13[%c1_129, %c0_130, %c0_131] : memref<2x1x32xf32, #tpu.memory_space<vmem>>, vector<1x1x32xf32>
    %255 = vector.shape_cast %254 : vector<1x1x32xf32> to vector<1x32xf32>
    %cst_132 = arith.constant dense<0.000000e+00> : vector<8xf32>
    %256 = vector.multi_reduction <add>, %251, %cst_132 [1] : vector<8x32xf32> to vector<8xf32>
    %257 = vector.shape_cast %256 : vector<8xf32> to vector<8x1xf32>
    %cst_133 = arith.constant 3.200000e+01 : f32
    %258 = vector.broadcast %cst_133 : f32 to vector<8x1xf32>
    %259 = arith.divf %257, %258 : vector<8x1xf32>
    %260 = vector.broadcast %259 : vector<8x1xf32> to vector<8x32xf32>
    %261 = arith.subf %251, %260 : vector<8x32xf32>
    %262 = arith.mulf %261, %261 : vector<8x32xf32>
    %cst_134 = arith.constant dense<0.000000e+00> : vector<8xf32>
    %263 = vector.multi_reduction <add>, %262, %cst_134 [1] : vector<8x32xf32> to vector<8xf32>
    %264 = vector.shape_cast %263 : vector<8xf32> to vector<8x1xf32>
    %cst_135 = arith.constant 3.200000e+01 : f32
    %265 = vector.broadcast %cst_135 : f32 to vector<8x1xf32>
    %266 = arith.divf %264, %265 : vector<8x1xf32>
    %cst_136 = arith.constant 9.99999974E-6 : f32
    %267 = vector.broadcast %cst_136 : f32 to vector<8x1xf32>
    %268 = arith.addf %266, %267 : vector<8x1xf32>
    %269 = math.rsqrt %268 : vector<8x1xf32>
    %270 = vector.broadcast %269 : vector<8x1xf32> to vector<8x32xf32>
    %271 = arith.mulf %261, %270 : vector<8x32xf32>
    %272 = vector.broadcast %253 : vector<1x32xf32> to vector<8x32xf32>
    %273 = arith.mulf %271, %272 : vector<8x32xf32>
    %274 = vector.broadcast %255 : vector<1x32xf32> to vector<8x32xf32>
    %275 = arith.addf %273, %274 : vector<8x32xf32>
    %c1_137 = arith.constant 1 : index
    %c0_138 = arith.constant 0 : index
    %c0_139 = arith.constant 0 : index
    %276 = vector.load %arg14[%c1_137, %c0_138, %c0_139] : memref<2x32x64xf32, #tpu.memory_space<vmem>>, vector<1x32x64xf32>
    %277 = vector.shape_cast %276 : vector<1x32x64xf32> to vector<32x64xf32>
    %cst_140 = arith.constant dense<0.000000e+00> : vector<8x64xf32>
    %278 = tpu.matmul %275, %277, %cst_140 {dimension_numbers = #tpu.dot_dimension_numbers<[1], [0], [0], [1], [0, 0, 1, 1], [], []>} : vector<8x32xf32>, vector<32x64xf32>, vector<8x64xf32> -> vector<8x64xf32>
    %c1_141 = arith.constant 1 : index
    %c0_142 = arith.constant 0 : index
    %c0_143 = arith.constant 0 : index
    %279 = vector.load %arg15[%c1_141, %c0_142, %c0_143] : memref<2x1x64xf32, #tpu.memory_space<vmem>>, vector<1x1x64xf32>
    %280 = vector.shape_cast %279 : vector<1x1x64xf32> to vector<1x64xf32>
    %281 = vector.broadcast %280 : vector<1x64xf32> to vector<8x64xf32>
    %282 = arith.addf %278, %281 : vector<8x64xf32>
    %cst_144 = arith.constant 5.000000e-01 : f32
    %283 = vector.broadcast %cst_144 : f32 to vector<8x64xf32>
    %284 = arith.mulf %283, %282 : vector<8x64xf32>
    %cst_145 = arith.constant 0.707106769 : f32
    %285 = vector.broadcast %cst_145 : f32 to vector<8x64xf32>
    %286 = arith.mulf %282, %285 : vector<8x64xf32>
    %287 = math.absf %286 : vector<8x64xf32>
    %cst_146 = arith.constant 0.327591091 : f32
    %288 = vector.broadcast %cst_146 : f32 to vector<8x64xf32>
    %289 = arith.mulf %288, %287 : vector<8x64xf32>
    %cst_147 = arith.constant 1.000000e+00 : f32
    %290 = vector.broadcast %cst_147 : f32 to vector<8x64xf32>
    %291 = arith.addf %290, %289 : vector<8x64xf32>
    %cst_148 = arith.constant 1.000000e+00 : f32
    %292 = vector.broadcast %cst_148 : f32 to vector<8x64xf32>
    %293 = arith.divf %292, %291 : vector<8x64xf32>
    %cst_149 = arith.constant 1.06140542 : f32
    %294 = vector.broadcast %cst_149 : f32 to vector<8x64xf32>
    %295 = arith.mulf %294, %293 : vector<8x64xf32>
    %cst_150 = arith.constant -1.45315206 : f32
    %296 = vector.broadcast %cst_150 : f32 to vector<8x64xf32>
    %297 = arith.addf %295, %296 : vector<8x64xf32>
    %298 = arith.mulf %297, %293 : vector<8x64xf32>
    %cst_151 = arith.constant 1.42141378 : f32
    %299 = vector.broadcast %cst_151 : f32 to vector<8x64xf32>
    %300 = arith.addf %298, %299 : vector<8x64xf32>
    %301 = arith.mulf %300, %293 : vector<8x64xf32>
    %cst_152 = arith.constant -0.284496725 : f32
    %302 = vector.broadcast %cst_152 : f32 to vector<8x64xf32>
    %303 = arith.addf %301, %302 : vector<8x64xf32>
    %304 = arith.mulf %303, %293 : vector<8x64xf32>
    %cst_153 = arith.constant 0.254829586 : f32
    %305 = vector.broadcast %cst_153 : f32 to vector<8x64xf32>
    %306 = arith.addf %304, %305 : vector<8x64xf32>
    %307 = arith.mulf %306, %293 : vector<8x64xf32>
    %cst_154 = arith.constant 0.000000e+00 : f32
    %308 = vector.broadcast %cst_154 : f32 to vector<8x64xf32>
    %309 = arith.subf %308, %287 : vector<8x64xf32>
    %310 = arith.mulf %309, %287 : vector<8x64xf32>
    %311 = math.exp %310 : vector<8x64xf32>
    %312 = arith.mulf %307, %311 : vector<8x64xf32>
    %cst_155 = arith.constant 1.000000e+00 : f32
    %313 = vector.broadcast %cst_155 : f32 to vector<8x64xf32>
    %314 = arith.subf %313, %312 : vector<8x64xf32>
    %cst_156 = arith.constant 0.000000e+00 : f32
    %315 = vector.broadcast %cst_156 : f32 to vector<8x64xf32>
    %316 = arith.cmpf olt, %286, %315 : vector<8x64xf32>
    %cst_157 = arith.constant 0.000000e+00 : f32
    %317 = vector.broadcast %cst_157 : f32 to vector<8x64xf32>
    %318 = arith.subf %317, %314 : vector<8x64xf32>
    %319 = arith.select %316, %318, %314 : vector<8x64xi1>, vector<8x64xf32>
    %cst_158 = arith.constant 1.000000e+00 : f32
    %320 = vector.broadcast %cst_158 : f32 to vector<8x64xf32>
    %321 = arith.addf %320, %319 : vector<8x64xf32>
    %322 = arith.mulf %284, %321 : vector<8x64xf32>
    %c1_159 = arith.constant 1 : index
    %c0_160 = arith.constant 0 : index
    %c0_161 = arith.constant 0 : index
    %323 = vector.load %arg16[%c1_159, %c0_160, %c0_161] : memref<2x64x32xf32, #tpu.memory_space<vmem>>, vector<1x64x32xf32>
    %324 = vector.shape_cast %323 : vector<1x64x32xf32> to vector<64x32xf32>
    %cst_162 = arith.constant dense<0.000000e+00> : vector<8x32xf32>
    %325 = tpu.matmul %322, %324, %cst_162 {dimension_numbers = #tpu.dot_dimension_numbers<[1], [0], [0], [1], [0, 0, 1, 1], [], []>} : vector<8x64xf32>, vector<64x32xf32>, vector<8x32xf32> -> vector<8x32xf32>
    %c1_163 = arith.constant 1 : index
    %c0_164 = arith.constant 0 : index
    %c0_165 = arith.constant 0 : index
    %326 = vector.load %arg17[%c1_163, %c0_164, %c0_165] : memref<2x1x32xf32, #tpu.memory_space<vmem>>, vector<1x1x32xf32>
    %327 = vector.shape_cast %326 : vector<1x1x32xf32> to vector<1x32xf32>
    %328 = vector.broadcast %327 : vector<1x32xf32> to vector<8x32xf32>
    %329 = arith.addf %325, %328 : vector<8x32xf32>
    %330 = arith.addf %251, %329 : vector<8x32xf32>
    %c0_166 = arith.constant 0 : index
    %c0_167 = arith.constant 0 : index
    %331 = vector.load %arg18[%c0_166, %c0_167] : memref<1x32xf32, #tpu.memory_space<vmem>>, vector<1x32xf32>
    %c0_168 = arith.constant 0 : index
    %c0_169 = arith.constant 0 : index
    %332 = vector.load %arg19[%c0_168, %c0_169] : memref<1x32xf32, #tpu.memory_space<vmem>>, vector<1x32xf32>
    %cst_170 = arith.constant dense<0.000000e+00> : vector<8xf32>
    %333 = vector.multi_reduction <add>, %330, %cst_170 [1] : vector<8x32xf32> to vector<8xf32>
    %334 = vector.shape_cast %333 : vector<8xf32> to vector<8x1xf32>
    %cst_171 = arith.constant 3.200000e+01 : f32
    %335 = vector.broadcast %cst_171 : f32 to vector<8x1xf32>
    %336 = arith.divf %334, %335 : vector<8x1xf32>
    %337 = vector.broadcast %336 : vector<8x1xf32> to vector<8x32xf32>
    %338 = arith.subf %330, %337 : vector<8x32xf32>
    %339 = arith.mulf %338, %338 : vector<8x32xf32>
    %cst_172 = arith.constant dense<0.000000e+00> : vector<8xf32>
    %340 = vector.multi_reduction <add>, %339, %cst_172 [1] : vector<8x32xf32> to vector<8xf32>
    %341 = vector.shape_cast %340 : vector<8xf32> to vector<8x1xf32>
    %cst_173 = arith.constant 3.200000e+01 : f32
    %342 = vector.broadcast %cst_173 : f32 to vector<8x1xf32>
    %343 = arith.divf %341, %342 : vector<8x1xf32>
    %cst_174 = arith.constant 9.99999974E-6 : f32
    %344 = vector.broadcast %cst_174 : f32 to vector<8x1xf32>
    %345 = arith.addf %343, %344 : vector<8x1xf32>
    %346 = math.rsqrt %345 : vector<8x1xf32>
    %347 = vector.broadcast %346 : vector<8x1xf32> to vector<8x32xf32>
    %348 = arith.mulf %338, %347 : vector<8x32xf32>
    %349 = vector.broadcast %331 : vector<1x32xf32> to vector<8x32xf32>
    %350 = arith.mulf %348, %349 : vector<8x32xf32>
    %351 = vector.broadcast %332 : vector<1x32xf32> to vector<8x32xf32>
    %352 = arith.addf %350, %351 : vector<8x32xf32>
    %353 = vector.extract_strided_slice %352 {offsets = [1, 0], sizes = [4, 32], strides = [1, 1]} : vector<8x32xf32> to vector<4x32xf32>
    %c0_175 = arith.constant 0 : index
    %c0_176 = arith.constant 0 : index
    %354 = vector.load %arg20[%c0_175, %c0_176] : memref<5x32xf32, #tpu.memory_space<vmem>>, vector<5x32xf32>
    %cst_177 = arith.constant dense<0.000000e+00> : vector<5x4xf32>
    %355 = tpu.matmul %354, %353, %cst_177 {dimension_numbers = #tpu.dot_dimension_numbers<[1], [1], [0], [0], [0, 0, 1, 0], [], []>} : vector<5x32xf32>, vector<4x32xf32>, vector<5x4xf32> -> vector<5x4xf32>
    %c0_178 = arith.constant 0 : index
    %c0_179 = arith.constant 0 : index
    %356 = vector.load %arg21[%c0_178, %c0_179] : memref<5x1xf32, #tpu.memory_space<vmem>>, vector<5x1xf32>
    %357 = vector.broadcast %356 : vector<5x1xf32> to vector<5x4xf32>
    %358 = arith.addf %355, %357 : vector<5x4xf32>
    %c0_180 = arith.constant 0 : index
    %c0_181 = arith.constant 0 : index
    %359 = vector.load %arg22[%c0_180, %c0_181] : memref<16x2xf32, #tpu.memory_space<vmem>>, vector<16x2xf32>
    %c0_182 = arith.constant 0 : index
    %c0_183 = arith.constant 0 : index
    %360 = vector.load %arg23[%c0_182, %c0_183] : memref<2x16xf32, #tpu.memory_space<vmem>>, vector<2x16xf32>
    %361 = vector.extract_strided_slice %358 {offsets = [0, 0], sizes = [1, 2], strides = [1, 1]} : vector<5x4xf32> to vector<1x2xf32>
    %362 = vector.extract_strided_slice %358 {offsets = [0, 2], sizes = [1, 2], strides = [1, 1]} : vector<5x4xf32> to vector<1x2xf32>
    %363 = tpu.concatenate %361, %362 in 0 : vector<1x2xf32>, vector<1x2xf32> -> vector<2x2xf32>
    %cst_184 = arith.constant dense<0.000000e+00> : vector<16x2xf32>
    %364 = tpu.matmul %359, %363, %cst_184 {dimension_numbers = #tpu.dot_dimension_numbers<[1], [0], [0], [1], [0, 0, 1, 1], [], []>} : vector<16x2xf32>, vector<2x2xf32>, vector<16x2xf32> -> vector<16x2xf32>
    %cst_185 = arith.constant dense<0.000000e+00> : vector<16x16xf32>
    %365 = tpu.matmul %364, %360, %cst_185 {dimension_numbers = #tpu.dot_dimension_numbers<[1], [0], [0], [1], [0, 0, 1, 1], [], []>} : vector<16x2xf32>, vector<2x16xf32>, vector<16x16xf32> -> vector<16x16xf32>
    %c0_186 = arith.constant 0 : index
    %c0_187 = arith.constant 0 : index
    %c0_188 = arith.constant 0 : index
    %c0_189 = arith.constant 0 : index
    %366 = vector.load %arg24[%c0_186, %c0_187, %c0_188, %c0_189] : memref<1x5x16x16xf32, #tpu.memory_space<vmem>>, vector<1x1x16x16xf32>
    %367 = vector.shape_cast %366 : vector<1x1x16x16xf32> to vector<16x16xf32>
    %368 = vector.shape_cast %365 : vector<16x16xf32> to vector<1x1x16x16xf32>
    tpu.vector_store %arg24[%c0_186, %c0_187, %c0_188, %c0_189], %368 {strides = array<i32>} : memref<1x5x16x16xf32, #tpu.memory_space<vmem>>, vector<1x1x16x16xf32>,
    %369 = vector.extract_strided_slice %358 {offsets = [1, 0], sizes = [1, 2], strides = [1, 1]} : vector<5x4xf32> to vector<1x2xf32>
    %370 = vector.extract_strided_slice %358 {offsets = [1, 2], sizes = [1, 2], strides = [1, 1]} : vector<5x4xf32> to vector<1x2xf32>
    %371 = tpu.concatenate %369, %370 in 0 : vector<1x2xf32>, vector<1x2xf32> -> vector<2x2xf32>
    %cst_190 = arith.constant dense<0.000000e+00> : vector<16x2xf32>
    %372 = tpu.matmul %359, %371, %cst_190 {dimension_numbers = #tpu.dot_dimension_numbers<[1], [0], [0], [1], [0, 0, 1, 1], [], []>} : vector<16x2xf32>, vector<2x2xf32>, vector<16x2xf32> -> vector<16x2xf32>
    %cst_191 = arith.constant dense<0.000000e+00> : vector<16x16xf32>
    %373 = tpu.matmul %372, %360, %cst_191 {dimension_numbers = #tpu.dot_dimension_numbers<[1], [0], [0], [1], [0, 0, 1, 1], [], []>} : vector<16x2xf32>, vector<2x16xf32>, vector<16x16xf32> -> vector<16x16xf32>
    %c0_192 = arith.constant 0 : index
    %c1_193 = arith.constant 1 : index
    %c0_194 = arith.constant 0 : index
    %c0_195 = arith.constant 0 : index
    %374 = vector.load %arg24[%c0_192, %c1_193, %c0_194, %c0_195] : memref<1x5x16x16xf32, #tpu.memory_space<vmem>>, vector<1x1x16x16xf32>
    %375 = vector.shape_cast %374 : vector<1x1x16x16xf32> to vector<16x16xf32>
    %376 = vector.shape_cast %373 : vector<16x16xf32> to vector<1x1x16x16xf32>
    tpu.vector_store %arg24[%c0_192, %c1_193, %c0_194, %c0_195], %376 {strides = array<i32>} : memref<1x5x16x16xf32, #tpu.memory_space<vmem>>, vector<1x1x16x16xf32>,
    %377 = vector.extract_strided_slice %358 {offsets = [2, 0], sizes = [1, 2], strides = [1, 1]} : vector<5x4xf32> to vector<1x2xf32>
    %378 = vector.extract_strided_slice %358 {offsets = [2, 2], sizes = [1, 2], strides = [1, 1]} : vector<5x4xf32> to vector<1x2xf32>
    %379 = tpu.concatenate %377, %378 in 0 : vector<1x2xf32>, vector<1x2xf32> -> vector<2x2xf32>
    %cst_196 = arith.constant dense<0.000000e+00> : vector<16x2xf32>
    %380 = tpu.matmul %359, %379, %cst_196 {dimension_numbers = #tpu.dot_dimension_numbers<[1], [0], [0], [1], [0, 0, 1, 1], [], []>} : vector<16x2xf32>, vector<2x2xf32>, vector<16x2xf32> -> vector<16x2xf32>
    %cst_197 = arith.constant dense<0.000000e+00> : vector<16x16xf32>
    %381 = tpu.matmul %380, %360, %cst_197 {dimension_numbers = #tpu.dot_dimension_numbers<[1], [0], [0], [1], [0, 0, 1, 1], [], []>} : vector<16x2xf32>, vector<2x16xf32>, vector<16x16xf32> -> vector<16x16xf32>
    %c0_198 = arith.constant 0 : index
    %c2 = arith.constant 2 : index
    %c0_199 = arith.constant 0 : index
    %c0_200 = arith.constant 0 : index
    %382 = vector.load %arg24[%c0_198, %c2, %c0_199, %c0_200] : memref<1x5x16x16xf32, #tpu.memory_space<vmem>>, vector<1x1x16x16xf32>
    %383 = vector.shape_cast %382 : vector<1x1x16x16xf32> to vector<16x16xf32>
    %384 = vector.shape_cast %381 : vector<16x16xf32> to vector<1x1x16x16xf32>
    tpu.vector_store %arg24[%c0_198, %c2, %c0_199, %c0_200], %384 {strides = array<i32>} : memref<1x5x16x16xf32, #tpu.memory_space<vmem>>, vector<1x1x16x16xf32>,
    %385 = vector.extract_strided_slice %358 {offsets = [3, 0], sizes = [1, 2], strides = [1, 1]} : vector<5x4xf32> to vector<1x2xf32>
    %386 = vector.extract_strided_slice %358 {offsets = [3, 2], sizes = [1, 2], strides = [1, 1]} : vector<5x4xf32> to vector<1x2xf32>
    %387 = tpu.concatenate %385, %386 in 0 : vector<1x2xf32>, vector<1x2xf32> -> vector<2x2xf32>
    %cst_201 = arith.constant dense<0.000000e+00> : vector<16x2xf32>
    %388 = tpu.matmul %359, %387, %cst_201 {dimension_numbers = #tpu.dot_dimension_numbers<[1], [0], [0], [1], [0, 0, 1, 1], [], []>} : vector<16x2xf32>, vector<2x2xf32>, vector<16x2xf32> -> vector<16x2xf32>
    %cst_202 = arith.constant dense<0.000000e+00> : vector<16x16xf32>
    %389 = tpu.matmul %388, %360, %cst_202 {dimension_numbers = #tpu.dot_dimension_numbers<[1], [0], [0], [1], [0, 0, 1, 1], [], []>} : vector<16x2xf32>, vector<2x16xf32>, vector<16x16xf32> -> vector<16x16xf32>
    %c0_203 = arith.constant 0 : index
    %c3 = arith.constant 3 : index
    %c0_204 = arith.constant 0 : index
    %c0_205 = arith.constant 0 : index
    %390 = vector.load %arg24[%c0_203, %c3, %c0_204, %c0_205] : memref<1x5x16x16xf32, #tpu.memory_space<vmem>>, vector<1x1x16x16xf32>
    %391 = vector.shape_cast %390 : vector<1x1x16x16xf32> to vector<16x16xf32>
    %392 = vector.shape_cast %389 : vector<16x16xf32> to vector<1x1x16x16xf32>
    tpu.vector_store %arg24[%c0_203, %c3, %c0_204, %c0_205], %392 {strides = array<i32>} : memref<1x5x16x16xf32, #tpu.memory_space<vmem>>, vector<1x1x16x16xf32>,
    %393 = vector.extract_strided_slice %358 {offsets = [4, 0], sizes = [1, 2], strides = [1, 1]} : vector<5x4xf32> to vector<1x2xf32>
    %394 = vector.extract_strided_slice %358 {offsets = [4, 2], sizes = [1, 2], strides = [1, 1]} : vector<5x4xf32> to vector<1x2xf32>
    %395 = tpu.concatenate %393, %394 in 0 : vector<1x2xf32>, vector<1x2xf32> -> vector<2x2xf32>
    %cst_206 = arith.constant dense<0.000000e+00> : vector<16x2xf32>
    %396 = tpu.matmul %359, %395, %cst_206 {dimension_numbers = #tpu.dot_dimension_numbers<[1], [0], [0], [1], [0, 0, 1, 1], [], []>} : vector<16x2xf32>, vector<2x2xf32>, vector<16x2xf32> -> vector<16x2xf32>
    %cst_207 = arith.constant dense<0.000000e+00> : vector<16x16xf32>
    %397 = tpu.matmul %396, %360, %cst_207 {dimension_numbers = #tpu.dot_dimension_numbers<[1], [0], [0], [1], [0, 0, 1, 1], [], []>} : vector<16x2xf32>, vector<2x16xf32>, vector<16x16xf32> -> vector<16x16xf32>
    %c0_208 = arith.constant 0 : index
    %c4 = arith.constant 4 : index
    %c0_209 = arith.constant 0 : index
    %c0_210 = arith.constant 0 : index
    %398 = vector.load %arg24[%c0_208, %c4, %c0_209, %c0_210] : memref<1x5x16x16xf32, #tpu.memory_space<vmem>>, vector<1x1x16x16xf32>
    %399 = vector.shape_cast %398 : vector<1x1x16x16xf32> to vector<16x16xf32>
    %400 = vector.shape_cast %397 : vector<16x16xf32> to vector<1x1x16x16xf32>
    tpu.vector_store %arg24[%c0_208, %c4, %c0_209, %c0_210], %400 {strides = array<i32>} : memref<1x5x16x16xf32, #tpu.memory_space<vmem>>, vector<1x1x16x16xf32>,
    return
  }
  func.func @transform_0(%arg0: i32) -> (i32, i32, i32) {
    %c0_i32 = arith.constant 0 : i32
    %c0_i32_0 = arith.constant 0 : i32
    %c0_i32_1 = arith.constant 0 : i32
    return %arg0, %c0_i32, %c0_i32_0 : i32, i32, i32
  }
  func.func @transform_1(%arg0: i32) -> (i32, i32) {
    %c0_i32 = arith.constant 0 : i32
    %c0_i32_0 = arith.constant 0 : i32
    %c0_i32_1 = arith.constant 0 : i32
    return %c0_i32, %c0_i32_0 : i32, i32
  }
  func.func @transform_2(%arg0: i32) -> (i32, i32) {
    %c0_i32 = arith.constant 0 : i32
    %c0_i32_0 = arith.constant 0 : i32
    %c0_i32_1 = arith.constant 0 : i32
    return %c0_i32, %c0_i32_0 : i32, i32
  }
  func.func @transform_3(%arg0: i32) -> (i32, i32) {
    %c0_i32 = arith.constant 0 : i32
    %c0_i32_0 = arith.constant 0 : i32
    %c0_i32_1 = arith.constant 0 : i32
    return %c0_i32, %c0_i32_0 : i32, i32
  }
  func.func @transform_4(%arg0: i32) -> (i32, i32) {
    %c0_i32 = arith.constant 0 : i32
    %c0_i32_0 = arith.constant 0 : i32
    %c0_i32_1 = arith.constant 0 : i32
    return %c0_i32, %c0_i32_0 : i32, i32
  }
  func.func @transform_5(%arg0: i32) -> (i32, i32, i32) {
    %c0_i32 = arith.constant 0 : i32
    %c0_i32_0 = arith.constant 0 : i32
    %c0_i32_1 = arith.constant 0 : i32
    %c0_i32_2 = arith.constant 0 : i32
    return %c0_i32, %c0_i32_0, %c0_i32_1 : i32, i32, i32
  }
  func.func @transform_6(%arg0: i32) -> (i32, i32, i32) {
    %c0_i32 = arith.constant 0 : i32
    %c0_i32_0 = arith.constant 0 : i32
    %c0_i32_1 = arith.constant 0 : i32
    %c0_i32_2 = arith.constant 0 : i32
    return %c0_i32, %c0_i32_0, %c0_i32_1 : i32, i32, i32
  }
  func.func @transform_7(%arg0: i32) -> (i32, i32, i32) {
    %c0_i32 = arith.constant 0 : i32
    %c0_i32_0 = arith.constant 0 : i32
    %c0_i32_1 = arith.constant 0 : i32
    %c0_i32_2 = arith.constant 0 : i32
    return %c0_i32, %c0_i32_0, %c0_i32_1 : i32, i32, i32
  }
  func.func @transform_8(%arg0: i32) -> (i32, i32, i32) {
    %c0_i32 = arith.constant 0 : i32
    %c0_i32_0 = arith.constant 0 : i32
    %c0_i32_1 = arith.constant 0 : i32
    %c0_i32_2 = arith.constant 0 : i32
    return %c0_i32, %c0_i32_0, %c0_i32_1 : i32, i32, i32
  }
  func.func @transform_9(%arg0: i32) -> (i32, i32, i32) {
    %c0_i32 = arith.constant 0 : i32
    %c0_i32_0 = arith.constant 0 : i32
    %c0_i32_1 = arith.constant 0 : i32
    %c0_i32_2 = arith.constant 0 : i32
    return %c0_i32, %c0_i32_0, %c0_i32_1 : i32, i32, i32
  }
  func.func @transform_10(%arg0: i32) -> (i32, i32, i32) {
    %c0_i32 = arith.constant 0 : i32
    %c0_i32_0 = arith.constant 0 : i32
    %c0_i32_1 = arith.constant 0 : i32
    %c0_i32_2 = arith.constant 0 : i32
    return %c0_i32, %c0_i32_0, %c0_i32_1 : i32, i32, i32
  }
  func.func @transform_11(%arg0: i32) -> (i32, i32, i32) {
    %c0_i32 = arith.constant 0 : i32
    %c0_i32_0 = arith.constant 0 : i32
    %c0_i32_1 = arith.constant 0 : i32
    %c0_i32_2 = arith.constant 0 : i32
    return %c0_i32, %c0_i32_0, %c0_i32_1 : i32, i32, i32
  }
  func.func @transform_12(%arg0: i32) -> (i32, i32, i32) {
    %c0_i32 = arith.constant 0 : i32
    %c0_i32_0 = arith.constant 0 : i32
    %c0_i32_1 = arith.constant 0 : i32
    %c0_i32_2 = arith.constant 0 : i32
    return %c0_i32, %c0_i32_0, %c0_i32_1 : i32, i32, i32
  }
  func.func @transform_13(%arg0: i32) -> (i32, i32, i32) {
    %c0_i32 = arith.constant 0 : i32
    %c0_i32_0 = arith.constant 0 : i32
    %c0_i32_1 = arith.constant 0 : i32
    %c0_i32_2 = arith.constant 0 : i32
    return %c0_i32, %c0_i32_0, %c0_i32_1 : i32, i32, i32
  }
  func.func @transform_14(%arg0: i32) -> (i32, i32, i32) {
    %c0_i32 = arith.constant 0 : i32
    %c0_i32_0 = arith.constant 0 : i32
    %c0_i32_1 = arith.constant 0 : i32
    %c0_i32_2 = arith.constant 0 : i32
    return %c0_i32, %c0_i32_0, %c0_i32_1 : i32, i32, i32
  }
  func.func @transform_15(%arg0: i32) -> (i32, i32, i32) {
    %c0_i32 = arith.constant 0 : i32
    %c0_i32_0 = arith.constant 0 : i32
    %c0_i32_1 = arith.constant 0 : i32
    %c0_i32_2 = arith.constant 0 : i32
    return %c0_i32, %c0_i32_0, %c0_i32_1 : i32, i32, i32
  }
  func.func @transform_16(%arg0: i32) -> (i32, i32, i32) {
    %c0_i32 = arith.constant 0 : i32
    %c0_i32_0 = arith.constant 0 : i32
    %c0_i32_1 = arith.constant 0 : i32
    %c0_i32_2 = arith.constant 0 : i32
    return %c0_i32, %c0_i32_0, %c0_i32_1 : i32, i32, i32
  }
  func.func @transform_17(%arg0: i32) -> (i32, i32) {
    %c0_i32 = arith.constant 0 : i32
    %c0_i32_0 = arith.constant 0 : i32
    %c0_i32_1 = arith.constant 0 : i32
    return %c0_i32, %c0_i32_0 : i32, i32
  }
  func.func @transform_18(%arg0: i32) -> (i32, i32) {
    %c0_i32 = arith.constant 0 : i32
    %c0_i32_0 = arith.constant 0 : i32
    %c0_i32_1 = arith.constant 0 : i32
    return %c0_i32, %c0_i32_0 : i32, i32
  }
  func.func @transform_19(%arg0: i32) -> (i32, i32) {
    %c0_i32 = arith.constant 0 : i32
    %c0_i32_0 = arith.constant 0 : i32
    %c0_i32_1 = arith.constant 0 : i32
    return %c0_i32, %c0_i32_0 : i32, i32
  }
  func.func @transform_20(%arg0: i32) -> (i32, i32) {
    %c0_i32 = arith.constant 0 : i32
    %c0_i32_0 = arith.constant 0 : i32
    %c0_i32_1 = arith.constant 0 : i32
    return %c0_i32, %c0_i32_0 : i32, i32
  }
  func.func @transform_21(%arg0: i32) -> (i32, i32) {
    %c0_i32 = arith.constant 0 : i32
    %c0_i32_0 = arith.constant 0 : i32
    %c0_i32_1 = arith.constant 0 : i32
    return %c0_i32, %c0_i32_0 : i32, i32
  }
  func.func @transform_22(%arg0: i32) -> (i32, i32) {
    %c0_i32 = arith.constant 0 : i32
    %c0_i32_0 = arith.constant 0 : i32
    %c0_i32_1 = arith.constant 0 : i32
    return %c0_i32, %c0_i32_0 : i32, i32
  }
  func.func @transform_23(%arg0: i32) -> (i32, i32, i32, i32) {
    %c0_i32 = arith.constant 0 : i32
    %c0_i32_0 = arith.constant 0 : i32
    %c0_i32_1 = arith.constant 0 : i32
    %c0_i32_2 = arith.constant 0 : i32
    return %arg0, %c0_i32, %c0_i32_0, %c0_i32_1 : i32, i32, i32, i32
  }
}

</mosaic_0001>

<bundles_post_ra>
// kernel: segmenter_forward.1
= control target key start
LH: loop header
LB: loop body
LE: loop exit
PB: predicated region body
PF: predicated region fallthrough
CT: control target
= control target key end

     0   :  { %s2772_s0 = inlined_call_operand.vmem [shape: f32[2,4,192], index: 0, kind: input, shape index: {}]   ;;  %s2773_s1 = inlined_call_operand.vmem [shape: f32[192,32], index: 1, kind: input, shape index: {}]   ;;  %s2774_s2 = inlined_call_operand.vmem [shape: f32[1,32], index: 2, kind: input, shape index: {}]   ;;  %s2775_s3 = inlined_call_operand.vmem [shape: f32[1,32], index: 3, kind: input, shape index: {}]   ;;  %s2776_s4 = inlined_call_operand.vmem [shape: f32[5,32], index: 4, kind: input, shape index: {}]   ;;  %s2777_s5 = inlined_call_operand.vmem [shape: f32[2,1,32], index: 5, kind: input, shape index: {}]   ;;  %s2778_s6 = inlined_call_operand.vmem [shape: f32[2,1,32], index: 6, kind: input, shape index: {}]   ;;  %s2779_s7 = inlined_call_operand.vmem [shape: f32[2,32,96], index: 7, kind: input, shape index: {}]   ;;  %s2780_s8 = inlined_call_operand.vmem [shape: f32[2,1,96], index: 8, kind: input, shape index: {}]   ;;  %s2781_s9 = inlined_call_operand.vmem [shape: f32[2,32,32], index: 9, kind: input, shape index: {}]   ;;  %s2782_s10 = inlined_call_operand.vmem [shape: f32[2,1,32], index: 10, kind: input, shape index: {}]   ;;  %s2783_s11 = inlined_call_operand.vmem [shape: f32[2,1,32], index: 11, kind: input, shape index: {}]   ;;  %s2784_s12 = inlined_call_operand.vmem [shape: f32[2,1,32], index: 12, kind: input, shape index: {}]   ;;  %s2785_s13 = inlined_call_operand.vmem [shape: f32[2,32,64], index: 13, kind: input, shape index: {}]   ;;  %s2786_s14 = inlined_call_operand.vmem [shape: f32[2,1,64], index: 14, kind: input, shape index: {}]   ;;  %s2787_s15 = inlined_call_operand.vmem [shape: f32[2,64,32], index: 15, kind: input, shape index: {}]   ;;  %s2788_s16 = inlined_call_operand.vmem [shape: f32[2,1,32], index: 16, kind: input, shape index: {}]   ;;  %s2789_s17 = inlined_call_operand.vmem [shape: f32[1,32], index: 17, kind: input, shape index: {}]   ;;  %s2790_s18 = inlined_call_operand.vmem [shape: f32[1,32], index: 18, kind: input, shape index: {}]   ;;  %s2791_s19 = inlined_call_operand.vmem [shape: f32[5,32], index: 19, kind: input, shape index: {}]   ;;  %s2792_s20 = inlined_call_operand.vmem [shape: f32[5,1], index: 20, kind: input, shape index: {}]   ;;  %s2793_s21 = inlined_call_operand.vmem [shape: f32[16,2], index: 21, kind: input, shape index: {}]   ;;  %s2794_s22 = inlined_call_operand.vmem [shape: f32[2,16], index: 22, kind: input, shape index: {}]   ;;  %s2795_s23 = inlined_call_operand.vmem [shape: f32[2,5,16,16], index: 23, kind: output, shape index: {}]  }
   0x1   :  { %2807 = sst [smem:[#allocation3_spill]] %s2772_s0 }
   0x2   :  { %2808 = sst [smem:[#allocation4_spill]] %s2773_s1 }
   0x3   :  { %2809 = sst [smem:[#allocation5_spill]] %s2774_s2 }
   0x4   :  { %2810 = sst [smem:[#allocation6_spill]] %s2775_s3 }
   0x5   :  { %2811 = sst [smem:[#allocation7_spill]] %s2776_s4  ;;  %s2334_s4 = smov 0  }
   0x6   :  { %2812 = sst [smem:[#allocation8_spill]] %s2777_s5 }
   0x7   :  { %2813 = sst [smem:[#allocation9_spill]] %s2778_s6 }
   0x8   :  { %2814 = sst [smem:[#allocation10_spill]] %s2779_s7 }
   0x9 LB: > { %2815 = sst [smem:[#allocation2_spill]] %s2203_s4  ;;  %s2023_s30 = sadd.s32 4294967295, %s2203_s4   ;;  %s2203_s4 = sphi %s2334_s4, %s33_s4  }
   0xa   : > { %p2027_p0 = scmp.ge.s32.totalorder %s2203_s4, 1  ;;  %p637_p1 = scmp.lt.s32.totalorder %s2203_s4, 3 }
   0xc   : > { %p638_p2 = pnand %p2027_p0, %p637_p1 }
   0xd   : > { %s2816_s5 = sld [smem:[#allocation4_spill]] (!%p638_p2)  ;;  %p701_p3 = scmp.lt.s32.totalorder (!%p638_p2), %s2023_s30, 1 }
   0xe   : > { %641 = sbr.rel (%p638_p2) target bundleno = 4755 (0x1293), region = 112  ;;  %s2817_s6 = sld [smem:[#allocation3_spill]] (!%p638_p2) }
   0xf   : > { %s2818_s4 = sld [smem:[#allocation5_spill]] (!%p638_p2)  ;;  %s2804_s28 = smov (!%p638_p2), 80  }
  0x10   : > { %s2819_s7 = sld [smem:[#allocation7_spill]] (!%p638_p2)  ;;  %s2802_s3 = smov (!%p638_p2), 64  }
  0x11   : > { %s2820_s29 = sld [smem:[#allocation6_spill]] (!%p638_p2)  ;;  %s2824_s25 = smov (!%p638_p2), 112  }
  0x12   : > { %s2822_s0 = sld [smem:[#allocation8_spill]] (!%p638_p2) }
  0x13   : > { %v727_v0 = vld [vmem:[%s2816_s5 + $0x78] sm:$0xff]  ;;  %v726_v1 = vld [vmem:[%s2816_s5 + $0x70] sm:$0xff]  ;;  %v725_v2 = vld [vmem:[%s2816_s5 + $0x68] sm:$0xff]  ;;  %s2831_s30 = smov (!%p701_p3, %s2023_s30), 1  ;;  %vm745_vm0 = vcmask 523264   ;;  %vm796_vm1 = vcmask 1040384  }
  0x14   : > { %748 = vmatpush.msra.mxu0 %v727_v0  ;;  %v735_v3 = vld [vmem:[%s2816_s5 + $0xb8] sm:$0xff]  ;;  %v724_v4 = vld [vmem:[%s2816_s5 + $0x60] sm:$0xff]  ;;  %v734_v5 = vld [vmem:[%s2816_s5 + $0xb0] sm:$0xff]  ;;  %s2122_s24 = sshll.u32 %s2831_s30, 3  ;;  %vm798_vm2 = vcmask 1044480   ;;  %vm805_vm3 = vcmask 261120  }
  0x15   : > { %776 = vmatpush.msra.mxu1 %v735_v3  ;;  %v733_v6 = vld [vmem:[%s2816_s5 + $0xa8] sm:$0xff]  ;;  %s705_s27 = scalar_lea.vmem %s2817_s6, %s2122_s24  ;;  %v723_v7 = vld [vmem:[%s2816_s5 + $0x58] sm:$0xff]  ;;  %v722_v8 = vld [vmem:[%s2816_s5 + $0x50] sm:$0xff]  ;;  %v2205_v41 = vmov 32.0   ;;  %s2821_s24 = sld [smem:[#allocation10_spill]]  ;;  %vm877_vm8 = vcmask 130048  }
  0x16   : > { %749 = vmatpush.msra.mxu0 %v726_v1  ;;  %v732_v9 = vld [vmem:[%s2816_s5 + $0xa0] sm:$0xff]  ;;  %v721_v11 = vld [vmem:[%s2816_s5 + $0x48] sm:$0xff]  ;;  %v731_v12 = vld [vmem:[%s2816_s5 + $0x98] sm:$0xff]  ;;  %2161 = vrcp.f32 %v2205_v41  ;;  %s2823_s26 = sld [smem:[#allocation9_spill]]  ;;  %s2806_s6 = smov 112   ;;  %vm904_vm10 = vcmask 64512  }
  0x17   : > { %777 = vmatpush.msra.mxu1 %v734_v5  ;;  %v711_v10 = vld [vmem:[%s705_s27] sm:$0xff]  ;;  %v730_v13 = vld [vmem:[%s2816_s5 + $0x90] sm:$0xff]  ;;  %v729_v15 = vld [vmem:[%s2816_s5 + $0x88] sm:$0xff]  ;;  %s2805_s27 = smov 96  }
  0x18   : > { %750 = vmatpush.msra.mxu0 %v725_v2  ;;  %741 = vst [vmem:[#allocation1] ss:$2 sm:$0xff] %v711_v10  ;;  %v720_v14 = vld [vmem:[%s2816_s5 + $0x40] sm:$0xff]  ;;  %v719_v16 = vld [vmem:[%s2816_s5 + $0x38] sm:$0xff]  ;;  %v718_v18 = vld [vmem:[%s2816_s5 + $0x30] sm:$0xff] }
  0x19   : > { %778 = vmatpush.msra.mxu1 %v733_v6  ;;  %v728_v17 = vld [vmem:[%s2816_s5 + $0x80] sm:$0xff]  ;;  %v717_v20 = vld [vmem:[%s2816_s5 + $0x28] sm:$0xff]  ;;  %v715_v22 = vld [vmem:[%s2816_s5 + $0x18] sm:$0xff] }
  0x1a   : > { %751 = vmatpush.msra.mxu0 %v724_v4  ;;  %v716_v21 = vld [vmem:[%s2816_s5 + $0x20] sm:$0xff]  ;;  %v714_v23 = vld [vmem:[%s2816_s5 + $0x10] sm:$0xff]  ;;  %v713_v24 = vld [vmem:[%s2816_s5 + $0x8] sm:$0xff] }
  0x1b   : > { %779 = vmatpush.msra.mxu1 %v732_v9  ;;  %v712_v25 = vld [vmem:[%s2816_s5] sm:$0xff]  ;;  %v846_v53 = vld [vmem:[%s2821_s24 + $0x18] sm:$0xff]  ;;  %v845_v54 = vld [vmem:[%s2821_s24 + $0x10] sm:$0xff] }
  0x1c   : > { %752 = vmatpush.msra.mxu0 %v723_v7  ;;  %v2142_v27 = vld [vmem:[%s2818_s4] ss:$0 sm:$0xff]  ;;  %v791_v31 = vld [vmem:[%s2819_s7 + $0x1] sm:$0xf]  ;;  %v2162_v42 = vpop.eup %2161  ;;  %866 = vmatpush.msra.mxu2 %v846_v53  ;;  %v844_v55 = vld [vmem:[%s2821_s24 + $0x8] sm:$0xff] }
  0x1d   : > { %780 = vmatpush.msra.mxu1 %v731_v12  ;;  %v788_v32 = vld [vmem:[%s2820_s29] sm:$0x1]  ;;  %v810_v43 = vmul.f32 32.0, %v2162_v42  ;;  %vm814_vm4 = vweird.f32 %v2162_v42  ;;  %s2803_s29 = smov 48  }
  0x1e   : > { %753 = vmatpush.msra.mxu0 %v722_v8  ;;  %v789_v33 = vld [vmem:[%s2819_s7] sm:$0x1]  ;;  %867 = vmatpush.msra.mxu2 %v845_v54 }
  0x1f   : > { %781 = vmatpush.msra.mxu1 %v730_v13  ;;  %v743_v19 = vld.sshfl [vmem:[#allocation1 + $0x8] sm:$0xff pattern:$0x75316420]  ;;  %v742_v26 = vld.sshfl [vmem:[#allocation1] sm:$0xff pattern:$0x75316420]  ;;  %v790_v36 = vadd.f32 %v789_v33, %v788_v32 }
  0x20   : > { %754 = vmatpush.msra.mxu0 %v721_v11  ;;  %v811_v44 = vsub.f32 1.0, %v810_v43  ;;  %v843_v56 = vld [vmem:[%s2821_s24] sm:$0xff]  ;;  %868 = vmatpush.msra.mxu2 %v844_v55  ;;  %v1017_v43 = vld [vmem:[%s2781_s9 + $0x18] sm:$0xff] }
  0x21   : > { %782 = vmatpush.msra.mxu1 %v729_v15  ;;  %v2143_v2 = vld [vmem:[%s2822_s0] ss:$0 sm:$0xff] }
  0x22   : > { %755 = vmatpush.msra.mxu0 %v720_v14  ;;  %v812_v45 = vmul.f32 %v2162_v42, %v811_v44  ;;  %869 = vmatpush.msra.mxu2 %v843_v56  ;;  %v2144_v5 = vld [vmem:[%s2823_s26] ss:$0 sm:$0xff]  ;;  %v800_v14 = vlaneseq  ;;  %v1016_v44 = vld [vmem:[%s2781_s9 + $0x10] sm:$0xff] }
  0x23   : > { %783 = vmatpush.msra.mxu1 %v728_v17  ;;  %v2145_v8 = vld [vmem:[%s2780_s8] ss:$0 sm:$0xff] }
  0x24   : > { %756 = vmatpush.msra.mxu0 %v719_v16  ;;  %2031 = vmatmul.msk.f32.vlgmr.msra.gmra.mxu1 %vm745_vm0, %v743_v19  ;;  %v813_v46 = vadd.f32 %v2162_v42, %v812_v45  ;;  %v2473_v15 = vand.u32 127, %v800_v14  ;;  %v1015_v45 = vld [vmem:[%s2781_s9 + $0x8] sm:$0xff] }
  0x25   : > { %1037 = vmatpush.msrb.mxu1 %v1017_v43 }
  0x26   : > { %757 = vmatpush.msra.mxu0 %v718_v18  ;;  %v2438_v47 = vsel %vm814_vm4, %v2162_v42, %v813_v46  ;;  %vm802_vm9 = vcmp.lt.s32.totalorder %v2473_v15, 5 }
  0x27   : > { %1038 = vmatpush.msrb.mxu1 %v1016_v44 }
  0x28   : > { %758 = vmatpush.msra.mxu0 %v717_v20 }
  0x29   : > { %1039 = vmatpush.msrb.mxu1 %v1015_v45 }
  0x2a   : > { %759 = vmatpush.msra.mxu0 %v716_v21 }
  0x2c   : > { %760 = vmatpush.msra.mxu0 %v715_v22 }
  0x2e   : > { %761 = vmatpush.msra.mxu0 %v714_v23 }
  0x30   : > { %762 = vmatpush.msra.mxu0 %v713_v24 }
  0x32   : > { %763 = vmatpush.msra.mxu0 %v712_v25 }
  0x33   : > { %764 = vmatmul.f32.vlgmr.msra.gmra.mxu0 %v742_v26 }
  0xa1   : > { %v785_v29 = vpop.f32.mrf.mxu1 }
  0xb0   : > { %v765_v28 = vpop.f32.mrf.mxu0 }
  0xb1   : > { %v766_v30 = vadd.f32 %v2142_v27, %v765_v28 }
  0xb3   : > { %v786_v34 = vadd.f32 %v785_v29, %v766_v30 }
  0xb5   : > { %v792_v35 = vadd.f32 %v791_v31, %v786_v34 }
  0xb7   : > { %v794_v37 = vrot.slane %v792_v35, 7 }
  0xb9   : > { %v797_v38 = vsel %vm796_vm1, %v790_v36, %v794_v37 }
  0xba   : > { %v2434_v39 = vsel %vm798_vm2, %v797_v38, 0.0 }
  0xbb   : > { %v806_v40 = vsel %vm805_vm3, %v2434_v39, 0.0 }
  0xbc   : > { %807 = vadd.xlane.f32.xlu0 %v806_v40 }
 0x12f   : > { %v808_v48 = vpop.xlane.xlu0 %807 }
 0x130   : > { %v816_v49 = vmul.f32 %v2438_v47, %v808_v48 }
 0x132   : > { %v817_v50 = vsub.f32 %v2434_v39, %v816_v49  ;;  %v1014_v49 = vld [vmem:[%s2781_s9] sm:$0xff] }
 0x133   : > { %1040 = vmatpush.msrb.mxu1 %v1014_v49 }
 0x134   : > { %v818_v51 = vmul.f32 %v817_v50, %v817_v50 }
 0x136   : > { %v819_v52 = vsel %vm805_vm3, %v818_v51, 0.0 }
 0x137   : > { %820 = vadd.xlane.f32.xlu0 %v819_v52  ;;  %v2146_v52 = vld [vmem:[%s2782_s10] ss:$0 sm:$0xff] }
 0x1aa   : > { %v821_v57 = vpop.xlane.xlu0 %820 }
 0x1ab   : > { %v822_v58 = vmul.f32 %v821_v57, %v2438_v47 }
 0x1ad   : > { %v823_v59 = vadd.f32 1e-05, %v822_v58 }
 0x1af   : > { %2163 = vrsqrt.f32 %v823_v59  ;;  %vm830_vm6 = vweird.f32 %v823_v59 }
 0x1b5   : > { %v2164_v60 = vpop.eup %2163 }
 0x1b6   : > { %v825_v61 = vmul.f32 %v2164_v60, %v823_v59  ;;  %vm831_vm5 = vweird.f32 %v2164_v60 }
 0x1b7   : > { %vm832_vm7 = vmor %vm830_vm6, %vm831_vm5 }
 0x1b8   : > { %v826_v62 = vmul.f32 %v2164_v60, %v825_v61 }
 0x1ba   : > { %v827_v63 = vmul.f32 0.5, %v826_v62  ;;  %v1081_v62 = vld [vmem:[%s2785_s13 + $0x18] sm:$0xff] }
 0x1bc   : > { %v828_v0 = vsub.f32 1.5, %v827_v63  ;;  %v1079_v63 = vld [vmem:[%s2785_s13 + $0x8] sm:$0xff] }
 0x1be   : > { %v829_v1 = vmul.f32 %v2164_v60, %v828_v0  ;;  %v1078_v0 = vld [vmem:[%s2785_s13] sm:$0xff] }
 0x1c0   : > { %v833_v3 = vsel %vm832_vm7, %v2164_v60, %v829_v1 }
 0x1c1   : > { %v834_v4 = vmul.f32 %v833_v3, %v817_v50 }
 0x1c3   : > { %v838_v6 = vmul.f32 %v2143_v2, %v834_v4 }
 0x1c5   : > { %v842_v7 = vadd.f32 %v2144_v5, %v838_v6 }
 0x1c7   : > { %2032 = vmatmul.msk.f32.vlgmr.msra.gmra.mxu2 %vm805_vm3, %v842_v7 }
 0x24a   : > { %v871_v9 = vpop.f32.mrf.mxu2 }
 0x24b   : > { %v872_v10 = vadd.f32 %v2145_v8, %v871_v9 }
 0x24d   : > { %942 = vrot.lane.b32.xlu2 %v872_v10, %s2806_s6  ;;  %875 = vrot.lane.b32.xlu1 %v872_v10, %s2805_s27  ;;  %s2826_s6 = smov 80   ;;  %s2827_s27 = smov 48  }
 0x255   : > { %944 = vrot.lane.b32.xlu1 %v872_v10, %s2804_s28  ;;  %s2211_s28 = smov 16  }
 0x2a7   : > { %v943_v13 = vpop.permute.xlu2 %942 }
 0x2bf   : > { %v876_v11 = vpop.permute.xlu1 %875 }
 0x2c0   : > { %2033 = vmatpush.xpose.msk.msra.mxu3 %vm877_vm8, %v876_v11 }
 0x2c3   : > { %2034 = vmatmul.msk.f32.vlgmr.msra.gmra.mxu3 %vm877_vm8, %v872_v10 }
 0x2c7   : > { %v945_v12 = vpop.permute.xlu1 %944 }
 0x2c8   : > { %2036 = vmatpush.xpose.msk.msrb.mxu2 %vm877_vm8, %v945_v12 }
 0x2cb   : > { %2037 = vmatmul.msk.f32.vlgmr.msrb.gmra.mxu2 %vm877_vm8, %v943_v13  ;;  %v2148_v13 = vld [vmem:[%s2784_s12] ss:$0 sm:$0xff] }
 0x2cc   : > { %1101 = vmatpush.msra.mxu2 %v1081_v62 }
 0x346   : > { %v899_v16 = vpop.f32.mrf.mxu3 }
 0x347   : > { %v902_v17 = vmul.f32 0.25, %v899_v16 }
 0x349   : > { %v903_v18 = vsel %vm802_vm9, %v902_v17, -1e+30  ;;  %v2149_v17 = vld [vmem:[%s2786_s14] ss:$0 sm:$0xff] }
 0x34a   : > { %v905_v19 = vsel %vm904_vm10, %v903_v18, -inf }
 0x34b   : > { %906 = vmax.xlane.f32.xlu2 %v905_v19 }
 0x34e   : > { %v967_v20 = vpop.f32.mrf.mxu2 }
 0x34f   : > { %v970_v21 = vmul.f32 0.25, %v967_v20 }
 0x351   : > { %v971_v22 = vsel %vm802_vm9, %v970_v21, -1e+30 }
 0x352   : > { %v972_v23 = vsel %vm904_vm10, %v971_v22, -inf }
 0x353   : > { %973 = vmax.xlane.f32.xlu0 %v972_v23 }
 0x363   : > { %983 = vrot.lane.b32.xlu2 %v872_v10, %s2803_s29  ;;  %s2825_s29 = smov 96  }
 0x3be   : > { %v907_v24 = vpop.xlane.xlu2 %906 }
 0x3bf   : > { %v908_v25 = vsub.f32 %v903_v18, %v907_v24  ;;  %v1156_v24 = vld [vmem:[%s2787_s15 + $0x38] sm:$0xff] }
 0x3c1   : > { %v909_v26 = vmul.f32 1.442695, %v908_v25  ;;  %v1155_v25 = vld [vmem:[%s2787_s15 + $0x30] sm:$0xff] }
 0x3c3   : > { %2165 = vpow2.f32 %v909_v26  ;;  %v1154_v26 = vld [vmem:[%s2787_s15 + $0x28] sm:$0xff] }
 0x3c6   : > { %v974_v27 = vpop.xlane.xlu0 %973  ;;  %v984_v40 = vpop.permute.xlu2 %983 }
 0x3c7   : > { %v975_v28 = vsub.f32 %v971_v22, %v974_v27  ;;  %v1153_v27 = vld [vmem:[%s2787_s15 + $0x20] sm:$0xff] }
 0x3c9   : > { %v2166_v29 = vpop.eup %2165  ;;  %v976_v30 = vmul.f32 1.442695, %v975_v28 }
 0x3ca   : > { %v911_v31 = vsel %vm904_vm10, %v2166_v29, 0.0 }
 0x3cb   : > { %2167 = vpow2.f32 %v976_v30  ;;  %912 = vadd.xlane.f32.xlu1 %v911_v31  ;;  %v1152_v30 = vld [vmem:[%s2787_s15 + $0x18] sm:$0xff] }
 0x3d1   : > { %v2168_v32 = vpop.eup %2167 }
 0x3d2   : > { %v978_v33 = vsel %vm904_vm10, %v2168_v32, 0.0 }
 0x3d3   : > { %979 = vadd.xlane.f32.xlu0 %v978_v33 }
 0x3e7   : > { %916 = vrot.lane.b32.xlu0 %v872_v10, %s2802_s3  ;;  %v2147_v10 = vld [vmem:[%s2783_s11] ss:$0 sm:$0xff]  ;;  %s2828_s3 = smov 64  }
 0x43e   : > { %v913_v34 = vpop.xlane.xlu1 %912 }
 0x43f   : > { %2169 = vrcp.f32 %v913_v34 }
 0x445   : > { %v2170_v36 = vpop.eup %2169 }
 0x446   : > { %v980_v35 = vpop.xlane.xlu0 %979  ;;  %v915_v38 = vmul.f32 %v2170_v36, %v2166_v29  ;;  %v1150_v36 = vld [vmem:[%s2787_s15 + $0x8] sm:$0xff] }
 0x447   : > { %2171 = vrcp.f32 %v980_v35 }
 0x44d   : > { %v2172_v41 = vpop.eup %2171 }
 0x44e   : > { %v982_v42 = vmul.f32 %v2172_v41, %v2168_v32  ;;  %v1151_v32 = vld [vmem:[%s2787_s15 + $0x10] sm:$0xff] }
 0x459   : > { %v917_v37 = vpop.permute.xlu0 %916 }
 0x45a   : > { %937 = vmatpush.msrb.mxu3 %v917_v37  ;;  %v1149_v37 = vld [vmem:[%s2787_s15] sm:$0xff] }
 0x45b   : > { %2035 = vmatmul.msk.f32.vlgmr.msrb.gmra.mxu3 %vm904_vm10, %v915_v38 }
 0x45c   : > { %1004 = vmatpush.msra.mxu3 %v984_v40 }
 0x45e   : > { %1172 = vmatpush.msrb.mxu3 %v1156_v24 }
 0x460   : > { %1173 = vmatpush.msrb.mxu3 %v1155_v25 }
 0x462   : > { %1174 = vmatpush.msrb.mxu3 %v1154_v26  ;;  %v2152_v26 = vld [vmem:[%s2823_s26 + $0x1] ss:$0 sm:$0xff] }
 0x463   : > { %2038 = vmatmul.msk.f32.vlgmr.msra.gmra.mxu3 %vm904_vm10, %v982_v42 }
 0x464   : > { %1175 = vmatpush.msrb.mxu3 %v1153_v27 }
 0x466   : > { %1176 = vmatpush.msrb.mxu3 %v1152_v30 }
 0x468   : > { %1177 = vmatpush.msrb.mxu3 %v1151_v32 }
 0x46a   : > { %1178 = vmatpush.msrb.mxu3 %v1150_v36 }
 0x46c   : > { %1179 = vmatpush.msrb.mxu3 %v1149_v37 }
 0x4de   : > { %v939_v46 = vpop.f32.mrf.mxu3 }
 0x4e6   : > { %v1006_v48 = vpop.f32.mrf.mxu3 }
 0x4e7   : > { %1010 = vrot.lane.b32.xlu0 %v1006_v48, %s2211_s28 }
 0x559   : > { %v1011_v50 = vpop.permute.xlu0 %1010 }
 0x55a   : > { %v1013_v51 = vsel %vm877_vm8, %v939_v46, %v1011_v50 }
 0x55b   : > { %2039 = vmatmul.msk.f32.vlgmr.msrb.gmra.mxu1 %vm805_vm3, %v1013_v51 }
 0x5d8   : > { %v1042_v53 = vpop.f32.mrf.mxu1 }
 0x5d9   : > { %v1043_v54 = vadd.f32 %v2146_v52, %v1042_v53 }
 0x5db   : > { %v2507_v55 = vadd.f32 %v1043_v54, %v2434_v39  ;;  %v1080_v39 = vld [vmem:[%s2785_s13 + $0x10] sm:$0xff] }
 0x5dc   : > { %1102 = vmatpush.msra.mxu2 %v1080_v39 }
 0x5dd   : > { %v1048_v56 = vsel %vm805_vm3, %v2507_v55, 0.0 }
 0x5de   : > { %1049 = vadd.xlane.f32.xlu1 %v1048_v56  ;;  %1103 = vmatpush.msra.mxu2 %v1079_v63 }
 0x5e0   : > { %1104 = vmatpush.msra.mxu2 %v1078_v0  ;;  %v2150_v0 = vld [vmem:[%s2788_s16] ss:$0 sm:$0xff] }
 0x651   : > { %v1050_v57 = vpop.xlane.xlu1 %1049 }
 0x652   : > { %v1051_v58 = vmul.f32 %v1050_v57, %v2438_v47 }
 0x654   : > { %v1052_v59 = vsub.f32 %v2507_v55, %v1051_v58 }
 0x656   : > { %v1053_v60 = vmul.f32 %v1052_v59, %v1052_v59 }
 0x658   : > { %v1054_v61 = vsel %vm805_vm3, %v1053_v60, 0.0 }
 0x659   : > { %1055 = vadd.xlane.f32.xlu0 %v1054_v61 }
 0x6cc   : > { %v1056_v1 = vpop.xlane.xlu0 %1055 }
 0x6cd   : > { %v1057_v2 = vmul.f32 %v1056_v1, %v2438_v47 }
 0x6cf   : > { %v1058_v3 = vadd.f32 1e-05, %v1057_v2 }
 0x6d1   : > { %2173 = vrsqrt.f32 %v1058_v3  ;;  %vm1065_vm12 = vweird.f32 %v1058_v3 }
 0x6d7   : > { %v2174_v4 = vpop.eup %2173 }
 0x6d8   : > { %v1060_v5 = vmul.f32 %v2174_v4, %v1058_v3  ;;  %vm1066_vm11 = vweird.f32 %v2174_v4 }
 0x6d9   : > { %vm1067_vm13 = vmor %vm1065_vm12, %vm1066_vm11 }
 0x6da   : > { %v1061_v6 = vmul.f32 %v2174_v4, %v1060_v5 }
 0x6dc   : > { %v1062_v7 = vmul.f32 0.5, %v1061_v6 }
 0x6de   : > { %v1063_v8 = vsub.f32 1.5, %v1062_v7 }
 0x6e0   : > { %v1064_v9 = vmul.f32 %v2174_v4, %v1063_v8 }
 0x6e2   : > { %v1068_v11 = vsel %vm1067_vm13, %v2174_v4, %v1064_v9 }
 0x6e3   : > { %v1069_v12 = vmul.f32 %v1068_v11, %v1052_v59  ;;  %v2045_v11 = vld [vmem:[%s2821_s24 + $0x28] sm:$0xff] }
 0x6e5   : > { %v1073_v14 = vmul.f32 %v2147_v10, %v1069_v12  ;;  %v2047_v10 = vld [vmem:[%s2821_s24 + $0x38] sm:$0xff]  ;;  %v2044_v12 = vld [vmem:[%s2821_s24 + $0x20] sm:$0xff] }
 0x6e6   : > { %1244 = vmatpush.msra.mxu1 %v2047_v10 }
 0x6e7   : > { %v1077_v16 = vadd.f32 %v2148_v13, %v1073_v14 }
 0x6e9   : > { %2040 = vmatmul.msk.f32.vlgmr.msra.gmra.mxu2 %vm805_vm3, %v1077_v16 }
 0x76c   : > { %v1106_v18 = vpop.f32.mrf.mxu2 }
 0x76d   : > { %v1107_v19 = vadd.f32 %v2149_v17, %v1106_v18 }
 0x76f   : > { %v1110_v20 = vmul.f32 0.70710677, %v1107_v19  ;;  %v1109_v62 = vmul.f32 0.5, %v1107_v19 }
 0x771   : > { %v1111_v21 = vand.u32 2147483647, %v1110_v20  ;;  %vm1144_vm5 = vcmp.lt.f32.partialorder %v1110_v20, 0.0 }
 0x773   : > { %v1112_v22 = vmul.f32 0.3275911, %v1111_v21  ;;  %v1138_v43 = vsub.f32 0.0, %v1111_v21 }
 0x775   : > { %v1113_v23 = vadd.f32 1.0, %v1112_v22  ;;  %v1139_v46 = vmul.f32 %v1138_v43, %v1111_v21 }
 0x777   : > { %2175 = vrcp.f32 %v1113_v23  ;;  %v1125_v33 = vand.u32 2147483648, %v1113_v23  ;;  %v1123_v35 = vand.u32 2147483647, %v1113_v23  ;;  %vm1119_vm15 = vweird.f32 %v1113_v23 }
 0x778   : > { %v1140_v50 = vmul.f32 1.442695, %v1139_v46 }
 0x779   : > { %v1126_v40 = vor.u32 1.1754944e-38, %v1125_v33  ;;  %vm1124_vm4 = vcmp.eq.f32.partialorder %v1123_v35, 8.507059e+37 }
 0x77a   : > { %2177 = vpow2.f32 %v1140_v50 }
 0x77d   : > { %v2176_v28 = vpop.eup %2175 }
 0x77e   : > { %v1115_v29 = vmul.f32 %v2176_v28, %v1113_v23  ;;  %vm1120_vm14 = vweird.f32 %v2176_v28  ;;  %v2151_v23 = vld [vmem:[%s2822_s0 + $0x1] ss:$0 sm:$0xff] }
 0x77f   : > { %vm1121_vm2 = vmor %vm1119_vm15, %vm1120_vm14 }
 0x780   : > { %v1116_v31 = vsub.f32 1.0, %v1115_v29  ;;  %v2178_v57 = vpop.eup %2177  ;;  %v2153_v29 = vld [vmem:[%s2780_s8 + $0x1] ss:$0 sm:$0xff] }
 0x782   : > { %v1117_v34 = vmul.f32 %v2176_v28, %v1116_v31 }
 0x784   : > { %v1118_v38 = vadd.f32 %v2176_v28, %v1117_v34 }
 0x786   : > { %v1122_v41 = vsel %vm1121_vm2, %v2176_v28, %v1118_v38 }
 0x787   : > { %v1127_v42 = vsel %vm1124_vm4, %v1126_v40, %v1122_v41 }
 0x788   : > { %v1129_v44 = vmul.f32 1.0614054, %v1127_v42 }
 0x78a   : > { %v1130_v45 = vadd.f32 -1.4531521, %v1129_v44 }
 0x78c   : > { %v1131_v48 = vmul.f32 %v1130_v45, %v1127_v42 }
 0x78e   : > { %v1132_v49 = vadd.f32 1.4214138, %v1131_v48 }
 0x790   : > { %v1133_v51 = vmul.f32 %v1132_v49, %v1127_v42 }
 0x792   : > { %v1134_v52 = vadd.f32 -0.28449672, %v1133_v51 }
 0x794   : > { %v1135_v53 = vmul.f32 %v1134_v52, %v1127_v42 }
 0x796   : > { %v1136_v54 = vadd.f32 0.2548296, %v1135_v53 }
 0x798   : > { %v1137_v56 = vmul.f32 %v1136_v54, %v1127_v42 }
 0x79a   : > { %v1142_v58 = vmul.f32 %v2178_v57, %v1137_v56 }
 0x79c   : > { %v1143_v59 = vsub.f32 1.0, %v1142_v58 }
 0x79e   : > { %v1145_v60 = vsub.f32 0.0, %v1143_v59 }
 0x7a0   : > { %v1146_v61 = vsel %vm1144_vm5, %v1145_v60, %v1143_v59 }
 0x7a1   : > { %v1147_v39 = vadd.f32 1.0, %v1146_v61 }
 0x7a3   : > { %v1148_v63 = vmul.f32 %v1147_v39, %v1109_v62  ;;  %v2059_v39 = vld [vmem:[%s2781_s9 + $0x38] sm:$0xff] }
 0x7a4   : > { %1415 = vmatpush.msra.mxu3 %v2059_v39 }
 0x7a5   : > { %2041 = vmatmul.msk.f32.vlgmr.msrb.gmra.mxu3 %vm745_vm0, %v1148_v63  ;;  %v2058_v63 = vld [vmem:[%s2781_s9 + $0x30] sm:$0xff] }
 0x7a6   : > { %1416 = vmatpush.msra.mxu3 %v2058_v63 }
 0x828   : > { %v1181_v1 = vpop.f32.mrf.mxu3 }
 0x829   : > { %v1182_v2 = vadd.f32 %v2150_v0, %v1181_v1  ;;  %v2057_v0 = vld [vmem:[%s2781_s9 + $0x28] sm:$0xff] }
 0x82a   : > { %1417 = vmatpush.msra.mxu3 %v2057_v0 }
 0x82b   : > { %v2566_v3 = vadd.f32 %v1182_v2, %v2507_v55  ;;  %v2046_v55 = vld [vmem:[%s2821_s24 + $0x30] sm:$0xff] }
 0x82c   : > { %1245 = vmatpush.msra.mxu1 %v2046_v55 }
 0x82d   : > { %v1189_v4 = vsel %vm805_vm3, %v2566_v3, 0.0 }
 0x82e   : > { %1190 = vadd.xlane.f32.xlu1 %v1189_v4  ;;  %1246 = vmatpush.msra.mxu1 %v2045_v11  ;;  %v2056_v4 = vld [vmem:[%s2781_s9 + $0x20] sm:$0xff] }
 0x82f   : > { %1418 = vmatpush.msra.mxu3 %v2056_v4 }
 0x830   : > { %1247 = vmatpush.msra.mxu1 %v2044_v12 }
 0x8a1   : > { %v1191_v5 = vpop.xlane.xlu1 %1190 }
 0x8a2   : > { %v1192_v6 = vmul.f32 %v1191_v5, %v2438_v47 }
 0x8a4   : > { %v1193_v7 = vsub.f32 %v2566_v3, %v1192_v6 }
 0x8a6   : > { %v1194_v8 = vmul.f32 %v1193_v7, %v1193_v7 }
 0x8a8   : > { %v1195_v9 = vsel %vm805_vm3, %v1194_v8, 0.0 }
 0x8a9   : > { %1196 = vadd.xlane.f32.xlu2 %v1195_v9 }
 0x91c   : > { %v1197_v13 = vpop.xlane.xlu2 %1196 }
 0x91d   : > { %v1198_v14 = vmul.f32 %v1197_v13, %v2438_v47 }
 0x91f   : > { %v1199_v16 = vadd.f32 1e-05, %v1198_v14 }
 0x921   : > { %2179 = vrsqrt.f32 %v1199_v16  ;;  %vm1206_vm7 = vweird.f32 %v1199_v16 }
 0x927   : > { %v2180_v17 = vpop.eup %2179 }
 0x928   : > { %v1201_v18 = vmul.f32 %v2180_v17, %v1199_v16  ;;  %vm1207_vm6 = vweird.f32 %v2180_v17 }
 0x929   : > { %vm1208_vm11 = vmor %vm1206_vm7, %vm1207_vm6  ;;  %vm1651_vm7 = vcmask 1041408  }
 0x92a   : > { %v1202_v19 = vmul.f32 %v2180_v17, %v1201_v18  ;;  %v2065_v18 = vld [vmem:[%s2785_s13 + $0x28] sm:$0xff] }
 0x92c   : > { %v1203_v20 = vmul.f32 0.5, %v1202_v19  ;;  %v2064_v19 = vld [vmem:[%s2785_s13 + $0x20] sm:$0xff] }
 0x92e   : > { %v1204_v21 = vsub.f32 1.5, %v1203_v20 }
 0x930   : > { %v1205_v22 = vmul.f32 %v2180_v17, %v1204_v21 }
 0x932   : > { %v1209_v24 = vsel %vm1208_vm11, %v2180_v17, %v1205_v22  ;;  %v2067_v17 = vld [vmem:[%s2785_s13 + $0x38] sm:$0xff] }
 0x933   : > { %v1210_v25 = vmul.f32 %v1209_v24, %v1193_v7  ;;  %v2154_v7 = vld [vmem:[%s2782_s10 + $0x1] ss:$0 sm:$0xff]  ;;  %1483 = vmatpush.msrb.mxu0 %v2067_v17 }
 0x935   : > { %v1214_v27 = vmul.f32 %v2151_v23, %v1210_v25 }
 0x937   : > { %v1218_v28 = vadd.f32 %v2152_v26, %v1214_v27 }
 0x939   : > { %2049 = vmatmul.msk.f32.vlgmr.msra.gmra.mxu1 %vm805_vm3, %v1218_v28 }
 0x9b6   : > { %v1249_v30 = vpop.f32.mrf.mxu1 }
 0x9b7   : > { %v1250_v31 = vadd.f32 %v2153_v29, %v1249_v30  ;;  %v2155_v29 = vld [vmem:[%s2783_s11 + $0x1] ss:$0 sm:$0xff] }
 0x9b9   : > { %1318 = vrot.lane.b32.xlu0 %v1250_v31, %s2824_s25  ;;  %1253 = vrot.lane.b32.xlu1 %v1250_v31, %s2825_s29  ;;  %s2123_s25 = smul.u32 80, %s2831_s30 }
 0x9c1   : > { %1320 = vrot.lane.b32.xlu1 %v1250_v31, %s2826_s6  ;;  %s2213_s6 = smov 126  }
 0xa2b   : > { %v1254_v32 = vpop.permute.xlu1 %1253  ;;  %v1319_v34 = vpop.permute.xlu0 %1318 }
 0xa2c   : > { %2050 = vmatpush.xpose.msk.msrb.mxu2 %vm877_vm8, %v1254_v32  ;;  %v2156_v32 = vld [vmem:[%s2784_s12 + $0x1] ss:$0 sm:$0xff] }
 0xa2f   : > { %2051 = vmatmul.msk.f32.vlgmr.msrb.gmra.mxu2 %vm877_vm8, %v1250_v31 }
 0xa33   : > { %v1321_v33 = vpop.permute.xlu1 %1320 }
 0xa34   : > { %2053 = vmatpush.xpose.msk.msrb.mxu1 %vm877_vm8, %v1321_v33 }
 0xa37   : > { %2054 = vmatmul.msk.f32.vlgmr.msrb.gmra.mxu1 %vm877_vm8, %v1319_v34 }
 0xab2   : > { %v1276_v35 = vpop.f32.mrf.mxu2 }
 0xab3   : > { %v1279_v36 = vmul.f32 0.25, %v1276_v35  ;;  %v2157_v35 = vld [vmem:[%s2786_s14 + $0x1] ss:$0 sm:$0xff] }
 0xab4   : > { %v1343_v37 = vpop.f32.mrf.mxu1 }
 0xab5   : > { %v1346_v38 = vmul.f32 0.25, %v1343_v37  ;;  %v1280_v40 = vsel %vm802_vm9, %v1279_v36, -1e+30 }
 0xab6   : > { %v1281_v41 = vsel %vm904_vm10, %v1280_v40, -inf }
 0xab7   : > { %1282 = vmax.xlane.f32.xlu1 %v1281_v41  ;;  %v1347_v42 = vsel %vm802_vm9, %v1346_v38, -1e+30 }
 0xab8   : > { %v1348_v43 = vsel %vm904_vm10, %v1347_v42, -inf }
 0xab9   : > { %1349 = vmax.xlane.f32.xlu2 %v1348_v43  ;;  %v2077_v43 = vld [vmem:[%s2787_s15 + $0x78] sm:$0xff] }
 0xaba   : > { %1556 = vmatpush.msra.mxu1 %v2077_v43 }
 0xad0   : > { %1359 = vrot.lane.b32.xlu1 %v1250_v31, %s2827_s27  ;;  %s710_s27 = scalar_lea.vmem %s2795_s23, %s2123_s25 }
 0xb2a   : > { %v1283_v44 = vpop.xlane.xlu1 %1282 }
 0xb2b   : > { %v1284_v45 = vsub.f32 %v1280_v40, %v1283_v44  ;;  %v2076_v44 = vld [vmem:[%s2787_s15 + $0x70] sm:$0xff] }
 0xb2c   : > { %v1350_v46 = vpop.xlane.xlu2 %1349  ;;  %1557 = vmatpush.msra.mxu1 %v2076_v44 }
 0xb2d   : > { %v1285_v48 = vmul.f32 1.442695, %v1284_v45  ;;  %v1351_v49 = vsub.f32 %v1347_v42, %v1350_v46  ;;  %v2075_v45 = vld [vmem:[%s2787_s15 + $0x68] sm:$0xff]  ;;  %v2074_v46 = vld [vmem:[%s2787_s15 + $0x60] sm:$0xff] }
 0xb2e   : > { %1558 = vmatpush.msra.mxu1 %v2075_v45  ;;  %v1601_v45 = vld [vmem:[%s2791_s19] sm:$0x1f] }
 0xb2f   : > { %2181 = vpow2.f32 %v1285_v48  ;;  %v1352_v50 = vmul.f32 1.442695, %v1351_v49 }
 0xb30   : > { %1559 = vmatpush.msra.mxu1 %v2074_v46 }
 0xb31   : > { %2183 = vpow2.f32 %v1352_v50  ;;  %v2073_v50 = vld [vmem:[%s2787_s15 + $0x58] sm:$0xff] }
 0xb32   : > { %1560 = vmatpush.msra.mxu1 %v2073_v50 }
 0xb35   : > { %v2182_v51 = vpop.eup %2181 }
 0xb36   : > { %v1287_v52 = vsel %vm904_vm10, %v2182_v51, 0.0 }
 0xb37   : > { %v2184_v53 = vpop.eup %2183  ;;  %1288 = vadd.xlane.f32.xlu0 %v1287_v52  ;;  %v2072_v52 = vld [vmem:[%s2787_s15 + $0x50] sm:$0xff] }
 0xb38   : > { %v1354_v15 = vsel %vm904_vm10, %v2184_v53, 0.0  ;;  %1561 = vmatpush.msra.mxu1 %v2072_v52 }
 0xb39   : > { %1355 = vadd.xlane.f32.xlu2 %v1354_v15 }
 0xb42   : > { %v1360_v60 = vpop.permute.xlu1 %1359 }
 0xb51   : > { %1292 = vrot.lane.b32.xlu2 %v1250_v31, %s2828_s3 }
 0xbaa   : > { %v1289_v54 = vpop.xlane.xlu0 %1288 }
 0xbab   : > { %2185 = vrcp.f32 %v1289_v54 }
 0xbac   : > { %v1356_v56 = vpop.xlane.xlu2 %1355 }
 0xbad   : > { %2187 = vrcp.f32 %v1356_v56  ;;  %v2071_v56 = vld [vmem:[%s2787_s15 + $0x48] sm:$0xff] }
 0xbae   : > { %1562 = vmatpush.msra.mxu1 %v2071_v56 }
 0xbb1   : > { %v2186_v57 = vpop.eup %2185 }
 0xbb2   : > { %v1291_v58 = vmul.f32 %v2186_v57, %v2182_v51  ;;  %v2070_v57 = vld [vmem:[%s2787_s15 + $0x40] sm:$0xff] }
 0xbb3   : > { %v2188_v61 = vpop.eup %2187  ;;  %1563 = vmatpush.msra.mxu1 %v2070_v57  ;;  %v1636_v57 = vld [vmem:[%s2793_s21 + $0x8] sm:$0xff] }
 0xbb4   : > { %v1293_v59 = vpop.permute.xlu2 %1292  ;;  %v1358_v62 = vmul.f32 %v2188_v61, %v2184_v53 }
 0xbb5   : > { %1313 = vmatpush.msra.mxu2 %v1293_v59 }
 0xbb6   : > { %2052 = vmatmul.msk.f32.vlgmr.msra.gmra.mxu2 %vm904_vm10, %v1291_v58 }
 0xbb7   : > { %1380 = vmatpush.msrb.mxu2 %v1360_v60 }
 0xbbe   : > { %2055 = vmatmul.msk.f32.vlgmr.msrb.gmra.mxu2 %vm904_vm10, %v1358_v62 }
 0xc39   : > { %v1315_v1 = vpop.f32.mrf.mxu2 }
 0xc41   : > { %v1382_v2 = vpop.f32.mrf.mxu2 }
 0xc42   : > { %1386 = vrot.lane.b32.xlu2 %v1382_v2, %s2211_s28 }
 0xc9c   : > { %v1387_v5 = vpop.permute.xlu2 %1386 }
 0xc9d   : > { %v1389_v6 = vsel %vm877_vm8, %v1315_v1, %v1387_v5 }
 0xc9e   : > { %2061 = vmatmul.msk.f32.vlgmr.msra.gmra.mxu3 %vm805_vm3, %v1389_v6 }
 0xd21   : > { %v1420_v8 = vpop.f32.mrf.mxu3 }
 0xd22   : > { %v1421_v9 = vadd.f32 %v2154_v7, %v1420_v8 }
 0xd24   : > { %v2634_v10 = vadd.f32 %v1421_v9, %v2566_v3  ;;  %v2066_v3 = vld [vmem:[%s2785_s13 + $0x30] sm:$0xff] }
 0xd25   : > { %1484 = vmatpush.msrb.mxu0 %v2066_v3 }
 0xd26   : > { %v1428_v55 = vsel %vm805_vm3, %v2634_v10, 0.0 }
 0xd27   : > { %1429 = vadd.xlane.f32.xlu2 %v1428_v55  ;;  %1485 = vmatpush.msrb.mxu0 %v2065_v18  ;;  %v2158_v18 = vld [vmem:[%s2788_s16 + $0x1] ss:$0 sm:$0xff] }
 0xd29   : > { %1486 = vmatpush.msrb.mxu0 %v2064_v19 }
 0xd9a   : > { %v1430_v11 = vpop.xlane.xlu2 %1429 }
 0xd9b   : > { %v1431_v12 = vmul.f32 %v1430_v11, %v2438_v47 }
 0xd9d   : > { %v1432_v13 = vsub.f32 %v2634_v10, %v1431_v12 }
 0xd9f   : > { %v1433_v14 = vmul.f32 %v1432_v13, %v1432_v13 }
 0xda1   : > { %v1434_v16 = vsel %vm805_vm3, %v1433_v14, 0.0 }
 0xda2   : > { %1435 = vadd.xlane.f32.xlu0 %v1434_v16 }
 0xe15   : > { %v1436_v20 = vpop.xlane.xlu0 %1435 }
 0xe16   : > { %v1437_v21 = vmul.f32 %v1436_v20, %v2438_v47 }
 0xe18   : > { %v1438_v22 = vadd.f32 1e-05, %v1437_v21 }
 0xe1a   : > { %2189 = vrsqrt.f32 %v1438_v22  ;;  %vm1445_vm10 = vweird.f32 %v1438_v22 }
 0xe20   : > { %v2190_v23 = vpop.eup %2189 }
 0xe21   : > { %v1440_v24 = vmul.f32 %v2190_v23, %v1438_v22  ;;  %vm1446_vm9 = vweird.f32 %v2190_v23 }
 0xe22   : > { %vm1447_vm12 = vmor %vm1445_vm10, %vm1446_vm9 }
 0xe23   : > { %v1441_v25 = vmul.f32 %v2190_v23, %v1440_v24 }
 0xe25   : > { %v1442_v26 = vmul.f32 0.5, %v1441_v25 }
 0xe27   : > { %v1443_v27 = vsub.f32 1.5, %v1442_v26 }
 0xe29   : > { %v1444_v28 = vmul.f32 %v2190_v23, %v1443_v27 }
 0xe2b   : > { %v1448_v30 = vsel %vm1447_vm12, %v2190_v23, %v1444_v28 }
 0xe2c   : > { %v1449_v31 = vmul.f32 %v1448_v30, %v1432_v13  ;;  %v1602_v30 = vld [vmem:[%s2792_s20] sm:$0x1f] }
 0xe2e   : > { %v1453_v33 = vmul.f32 %v2155_v29, %v1449_v31 }
 0xe30   : > { %v1457_v34 = vadd.f32 %v2156_v32, %v1453_v33 }
 0xe32   : > { %2069 = vmatmul.msk.f32.vlgmr.msrb.gmra.mxu0 %vm805_vm3, %v1457_v34 }
 0xeaf   : > { %v1488_v36 = vpop.f32.mrf.mxu0 }
 0xeb0   : > { %v1489_v37 = vadd.f32 %v2157_v35, %v1488_v36 }
 0xeb2   : > { %v1492_v38 = vmul.f32 0.70710677, %v1489_v37  ;;  %v1491_v16 = vmul.f32 0.5, %v1489_v37 }
 0xeb4   : > { %v1493_v40 = vand.u32 2147483647, %v1492_v38  ;;  %vm1526_vm4 = vcmp.lt.f32.partialorder %v1492_v38, 0.0 }
 0xeb6   : > { %v1494_v41 = vmul.f32 0.3275911, %v1493_v40  ;;  %v1520_v62 = vsub.f32 0.0, %v1493_v40 }
 0xeb8   : > { %v1495_v42 = vadd.f32 1.0, %v1494_v41  ;;  %v1521_v0 = vmul.f32 %v1520_v62, %v1493_v40  ;;  %v2160_v41 = vld [vmem:[%s2790_s18] ss:$0 sm:$0xff] }
 0xeba   : > { %2191 = vrcp.f32 %v1495_v42  ;;  %v1507_v53 = vand.u32 2147483648, %v1495_v42  ;;  %v1505_v54 = vand.u32 2147483647, %v1495_v42  ;;  %vm1501_vm14 = vweird.f32 %v1495_v42 }
 0xebb   : > { %v1522_v4 = vmul.f32 1.442695, %v1521_v0 }
 0xebc   : > { %v1508_v59 = vor.u32 1.1754944e-38, %v1507_v53  ;;  %vm1506_vm2 = vcmp.eq.f32.partialorder %v1505_v54, 8.507059e+37  ;;  %v1635_v54 = vld [vmem:[%s2793_s21] sm:$0xff] }
 0xebd   : > { %2193 = vpow2.f32 %v1522_v4 }
 0xec0   : > { %v2192_v48 = vpop.eup %2191 }
 0xec1   : > { %v1497_v49 = vmul.f32 %v2192_v48, %v1495_v42  ;;  %vm1502_vm13 = vweird.f32 %v2192_v48 }
 0xec2   : > { %vm1503_vm15 = vmor %vm1501_vm14, %vm1502_vm13 }
 0xec3   : > { %v1498_v51 = vsub.f32 1.0, %v1497_v49  ;;  %v2194_v55 = vpop.eup %2193 }
 0xec5   : > { %v1499_v15 = vmul.f32 %v2192_v48, %v1498_v51 }
 0xec7   : > { %v1500_v58 = vadd.f32 %v2192_v48, %v1499_v15 }
 0xec9   : > { %v1504_v60 = vsel %vm1503_vm15, %v2192_v48, %v1500_v58  ;;  %v1637_v58 = vld [vmem:[%s2794_s22] sm:$0x3] }
 0xeca   : > { %v1509_v61 = vsel %vm1506_vm2, %v1508_v59, %v1504_v60  ;;  %2085 = vmatpush.msk.msra.mxu0 %vm1651_vm7, %v1637_v58  ;;  %2091 = vmatpush.msk.msrb.mxu1 %vm1651_vm7, %v1637_v58 }
 0xecb   : > { %v1511_v39 = vmul.f32 1.0614054, %v1509_v61 }
 0xecc   : > { %2099 = vmatpush.msk.msrb.mxu0 %vm1651_vm7, %v1637_v58 }
 0xecd   : > { %v1512_v63 = vadd.f32 -1.4531521, %v1511_v39 }
 0xecf   : > { %v1513_v1 = vmul.f32 %v1512_v63, %v1509_v61 }
 0xed1   : > { %v1514_v2 = vadd.f32 1.4214138, %v1513_v1 }
 0xed3   : > { %v1515_v5 = vmul.f32 %v1514_v2, %v1509_v61 }
 0xed5   : > { %v1516_v6 = vadd.f32 -0.28449672, %v1515_v5 }
 0xed7   : > { %v1517_v7 = vmul.f32 %v1516_v6, %v1509_v61 }
 0xed9   : > { %v1518_v8 = vadd.f32 0.2548296, %v1517_v7 }
 0xedb   : > { %v1519_v9 = vmul.f32 %v1518_v8, %v1509_v61 }
 0xedd   : > { %v1524_v11 = vmul.f32 %v2194_v55, %v1519_v9 }
 0xedf   : > { %v1525_v12 = vsub.f32 1.0, %v1524_v11 }
 0xee1   : > { %v1527_v13 = vsub.f32 0.0, %v1525_v12 }
 0xee3   : > { %v1528_v14 = vsel %vm1526_vm4, %v1527_v13, %v1525_v12 }
 0xee4   : > { %v1529_v17 = vadd.f32 1.0, %v1528_v14 }
 0xee6   : > { %v1530_v3 = vmul.f32 %v1529_v17, %v1491_v16 }
 0xee8   : > { %2079 = vmatmul.msk.f32.vlgmr.msra.gmra.mxu1 %vm745_vm0, %v1530_v3 }
 0xee9   : > { %2107 = vmatpush.msk.msra.mxu1 %vm1651_vm7, %v1637_v58 }
 0xf65   : > { %v1565_v19 = vpop.f32.mrf.mxu1 }
 0xf66   : > { %v1566_v20 = vadd.f32 %v2158_v18, %v1565_v19 }
 0xf68   : > { %v1568_v21 = vadd.f32 %v1566_v20, %v2634_v10  ;;  %v2212_v10 = vmov 0  }
 0xf69   : > { %2141 = vset.pattern.permute.xlu0 %v2212_v10 }
 0xf6a   : > { %v1571_v22 = vsel %vm805_vm3, %v1568_v21, 0.0 }
 0xf6b   : > { %1572 = vadd.xlane.f32.xlu0 %v1571_v22 }
 0xf7f   : > { %1605 = vperm.xlu0 %2141, %v1602_v30  }
 0xfde   : > { %v1573_v23 = vpop.xlane.xlu0 %1572 }
 0xfdf   : > { %v1574_v24 = vmul.f32 %v1573_v23, %v2438_v47 }
 0xfe1   : > { %v1575_v25 = vsub.f32 %v1568_v21, %v1574_v24 }
 0xfe3   : > { %v1576_v26 = vmul.f32 %v1575_v25, %v1575_v25 }
 0xfe5   : > { %v1577_v27 = vsel %vm805_vm3, %v1576_v26, 0.0 }
 0xfe6   : > { %1578 = vadd.xlane.f32.xlu1 %v1577_v27 }
 0xff1   : > { %v1606_v46 = vpop.permute.xlu0 %1605 }
0x1059   : > { %v1579_v28 = vpop.xlane.xlu1 %1578 }
0x105a   : > { %v1580_v29 = vmul.f32 %v1579_v28, %v2438_v47  ;;  %v2159_v47 = vld [vmem:[%s2789_s17] ss:$0 sm:$0xff] }
0x105c   : > { %v1581_v31 = vadd.f32 1e-05, %v1580_v29 }
0x105e   : > { %2195 = vrsqrt.f32 %v1581_v31  ;;  %vm1588_vm5 = vweird.f32 %v1581_v31 }
0x1064   : > { %v2196_v32 = vpop.eup %2195 }
0x1065   : > { %v1583_v33 = vmul.f32 %v2196_v32, %v1581_v31  ;;  %vm1589_vm0 = vweird.f32 %v2196_v32 }
0x1066   : > { %vm1590_vm6 = vmor %vm1588_vm5, %vm1589_vm0 }
0x1067   : > { %v1584_v34 = vmul.f32 %v2196_v32, %v1583_v33 }
0x1069   : > { %v1585_v35 = vmul.f32 0.5, %v1584_v34 }
0x106b   : > { %v1586_v36 = vsub.f32 1.5, %v1585_v35 }
0x106d   : > { %v1587_v37 = vmul.f32 %v2196_v32, %v1586_v36 }
0x106f   : > { %v1591_v38 = vsel %vm1590_vm6, %v2196_v32, %v1587_v37 }
0x1070   : > { %v1592_v40 = vmul.f32 %v1591_v38, %v1575_v25 }
0x1072   : > { %v1596_v42 = vmul.f32 %v2159_v47, %v1592_v40 }
0x1074   : > { %v1600_v43 = vadd.f32 %v2160_v41, %v1596_v42 }
0x1076   : > { %v1609_v44 = vrot.slane %v1600_v43, 1 }
0x1078   : > { %2080 = vmatpush.xpose.msk.msra.mxu2 %vm805_vm3, %v1609_v44 }
0x107b   : > { %2081 = vmatmul.msk.f32.vlgmr.msra.gmra.mxu2 %vm805_vm3, %v1601_v45  ;;  %vm1644_vm3 = vcmask 15360  }
0x10fe   : > { %v1632_v48 = vpop.f32.mrf.mxu2 }
0x10ff   : > { %v1633_v49 = vadd.f32 %v1632_v48, %v1606_v46 }
0x1101   : > { %1714 = vrot.lane.b32.xlu1 %v1633_v49, %s2213_s6  ;;  %v1712_v50 = vrot.slane %v1633_v49, 1  ;;  %v1639_v51 = vrot.slane %v1633_v49, 7  ;;  %v1840_v52 = vrot.slane %v1633_v49, 3  ;;  %v1776_v53 = vrot.slane %v1633_v49, 2 }
0x1102   : > { %v1904_v0 = vrot.slane %v1633_v49, 4 }
0x1103   : > { %1778 = vrot.lane.b32.xlu0 %v1712_v50, %s2213_s6  ;;  %1640 = vrot.lane.b32.xlu2 %v1639_v51, %s2213_s6 }
0x110b   : > { %1906 = vrot.lane.b32.xlu0 %v1840_v52, %s2213_s6  ;;  %1842 = vrot.lane.b32.xlu2 %v1776_v53, %s2213_s6 }
0x115d   : > { %v1641_v15 = vpop.permute.xlu2 %1640 }
0x115e   : > { %v1643_v56 = vsel %vm796_vm1, %v1633_v49, %v1641_v15 }
0x115f   : > { %2082 = vmatpush.msk.msrb.mxu3 %vm1651_vm7, %v1643_v56 }
0x1160   : > { %2083 = vmatmul.msk.f32.vlgmr.msrb.gmra.mxu3 %vm1644_vm3, %v1635_v54 }
0x1165   : > { %v1843_v59 = vpop.permute.xlu2 %1842 }
0x1166   : > { %v1845_v62 = vsel %vm796_vm1, %v1840_v52, %v1843_v59 }
0x1168   : > { %2084 = vmatmul.msk.f32.gmra.mxu3 %vm1644_vm3, %v1636_v57 }
0x1173   : > { %v1715_v60 = vpop.permute.xlu1 %1714 }
0x1174   : > { %v1717_v61 = vsel %vm796_vm1, %v1712_v50, %v1715_v60 }
0x1175   : > { %v1779_v39 = vpop.permute.xlu0 %1778  ;;  %2088 = vmatpush.msk.msrb.mxu2 %vm1651_vm7, %v1717_v61 }
0x1176   : > { %v1781_v63 = vsel %vm796_vm1, %v1776_v53, %v1779_v39  ;;  %2089 = vmatmul.msk.f32.vlgmr.msrb.gmra.mxu2 %vm1644_vm3, %v1635_v54 }
0x1177   : > { %2104 = vmatpush.msk.msra.mxu2 %vm1651_vm7, %v1845_v62  ;;  %2096 = vmatpush.msk.msra.mxu3 %vm1651_vm7, %v1781_v63 }
0x1178   : > { %2097 = vmatmul.msk.f32.vlgmr.msra.gmra.mxu3 %vm1644_vm3, %v1635_v54 }
0x117d   : > { %v1907_v1 = vpop.permute.xlu0 %1906 }
0x117e   : > { %v1909_v2 = vsel %vm796_vm1, %v1904_v0, %v1907_v1  ;;  %2090 = vmatmul.msk.f32.gmra.mxu2 %vm1644_vm3, %v1636_v57 }
0x117f   : > { %2112 = vmatpush.msk.msrb.mxu3 %vm1651_vm7, %v1909_v2 }
0x1180   : > { %2098 = vmatmul.msk.f32.gmra.mxu3 %vm1644_vm3, %v1636_v57 }
0x1186   : > { %2105 = vmatmul.msk.f32.vlgmr.msra.gmra.mxu2 %vm1644_vm3, %v1635_v54 }
0x1188   : > { %2113 = vmatmul.msk.f32.vlgmr.msrb.gmra.mxu3 %vm1644_vm3, %v1635_v54 }
0x118e   : > { %2106 = vmatmul.msk.f32.gmra.mxu2 %vm1644_vm3, %v1636_v57 }
0x1190   : > { %2114 = vmatmul.msk.f32.gmra.mxu3 %vm1644_vm3, %v1636_v57 }
0x11e3   : > { %v1672_v4 = vpop.f32.mrf.mxu3 }
0x11e4   : > { %2086 = vmatmul.msk.f32.vlgmr.msra.gmra.mxu0 %vm1644_vm3, %v1672_v4 }
0x11e5   : > { %2115 = vmatpush.msk.msra.mxu0 %vm1651_vm7, %v1637_v58 }
0x11eb   : > { %v1675_v5 = vpop.f32.mrf.mxu3 }
0x11ec   : > { %2087 = vmatmul.msk.f32.gmra.mxu0 %vm1644_vm3, %v1675_v5 }
0x11f9   : > { %v1738_v6 = vpop.f32.mrf.mxu2 }
0x11fa   : > { %2092 = vmatmul.msk.f32.vlgmr.msrb.gmra.mxu1 %vm1644_vm3, %v1738_v6 }
0x11fb   : > { %v1802_v7 = vpop.f32.mrf.mxu3 }
0x11fc   : > { %2100 = vmatmul.msk.f32.vlgmr.msrb.gmra.mxu0 %vm1644_vm3, %v1802_v7 }
0x1201   : > { %v1741_v8 = vpop.f32.mrf.mxu2 }
0x1202   : > { %2093 = vmatmul.msk.f32.gmra.mxu1 %vm1644_vm3, %v1741_v8 }
0x1203   : > { %v1805_v9 = vpop.f32.mrf.mxu3 }
0x1204   : > { %2101 = vmatmul.msk.f32.gmra.mxu0 %vm1644_vm3, %v1805_v9 }
0x1209   : > { %v1866_v55 = vpop.f32.mrf.mxu2 }
0x120a   : > { %2108 = vmatmul.msk.f32.vlgmr.msra.gmra.mxu1 %vm1644_vm3, %v1866_v55 }
0x120b   : > { %v1930_v11 = vpop.f32.mrf.mxu3 }
0x120c   : > { %2116 = vmatmul.msk.f32.vlgmr.msra.gmra.mxu0 %vm1644_vm3, %v1930_v11 }
0x1211   : > { %v1869_v12 = vpop.f32.mrf.mxu2 }
0x1212   : > { %2109 = vmatmul.msk.f32.gmra.mxu1 %vm1644_vm3, %v1869_v12 }
0x1213   : > { %v1933_v13 = vpop.f32.mrf.mxu3 }
0x1214   : > { %2117 = vmatmul.msk.f32.gmra.mxu0 %vm1644_vm3, %v1933_v13 }
0x1261   : > { %v1704_v14 = vpop.f32.mrf.mxu0 }
0x1262   : > { %1710 = vst.msk [vmem:[%s710_s27] sm:$0xff] %vm877_vm8, %v1704_v14 }
0x1269   : > { %v1707_v16 = vpop.f32.mrf.mxu0 }
0x126a   : > { %1711 = vst.msk [vmem:[%s710_s27 + $0x8] sm:$0xff] %vm877_vm8, %v1707_v16 }
0x1277   : > { %v1767_v17 = vpop.f32.mrf.mxu1 }
0x1278   : > { %2094 = vst.msk [vmem:[%s710_s27 + $0x10] sm:$0xff] %vm877_vm8, %v1767_v17 }
0x1279   : > { %v1831_v3 = vpop.f32.mrf.mxu0 }
0x127a   : > { %2102 = vst.msk [vmem:[%s710_s27 + $0x20] sm:$0xff] %vm877_vm8, %v1831_v3 }
0x127f   : > { %v1770_v18 = vpop.f32.mrf.mxu1 }
0x1280   : > { %2095 = vst.msk [vmem:[%s710_s27 + $0x18] sm:$0xff] %vm877_vm8, %v1770_v18 }
0x1281   : > { %v1834_v19 = vpop.f32.mrf.mxu0 }
0x1282   : > { %2103 = vst.msk [vmem:[%s710_s27 + $0x28] sm:$0xff] %vm877_vm8, %v1834_v19 }
0x1287   : > { %v1895_v20 = vpop.f32.mrf.mxu1 }
0x1288   : > { %2110 = vst.msk [vmem:[%s710_s27 + $0x30] sm:$0xff] %vm877_vm8, %v1895_v20 }
0x1289   : > { %v1959_v21 = vpop.f32.mrf.mxu0 }
0x128a   : > { %2118 = vst.msk [vmem:[%s710_s27 + $0x40] sm:$0xff] %vm877_vm8, %v1959_v21 }
0x128f   : > { %v1898_v22 = vpop.f32.mrf.mxu1 }
0x1290   : > { %2111 = vst.msk [vmem:[%s710_s27 + $0x38] sm:$0xff] %vm877_vm8, %v1898_v22 }
0x1291   : > { %v1962_v23 = vpop.f32.mrf.mxu0 }
0x1292   : > { %2119 = vst.msk [vmem:[%s710_s27 + $0x48] sm:$0xff] %vm877_vm8, %v1962_v23 }
0x1293 PF: > { %s2829_s30 = sld [smem:[#allocation2_spill]] }
0x1299   : > { %s33_s4 = sadd.s32 1, %s2829_s30  }
0x129a   : > { %p30_p4 = scmp.ge.s32.totalorder %s33_s4, 4  }
0x129c   :  { %32 = sbr.rel (!%p30_p4) target bundleno = 9 (0x9), region = 158 }

</bundles_post_ra>
